<compile_context>
chip_gen: v7x
topology: tpu7x:2x2x1
jax: 0.10.0
libtpu: 0.0.40
codegen_flags: <defaults>
</compile_context>

<pallas_src>
import functools
import math

import jax
import jax.numpy as jnp
from jax.experimental import pallas as pl
from jax.experimental.pallas import tpu as pltpu


# -----------------------------------------------------------------------------
# Pallas kernel: one (batch, query-tile) step per grid point.
# -----------------------------------------------------------------------------
def _encoder_layer_kernel(
    seq_ref,                      # (1, S, D)  f32  full sequence (for K/V)
    bias_ref,                     # (1, TQ, S) bf16 additive attention bias
    ln1_g_ref, ln1_b_ref,         # (1, D) f32
    wq_ref, bq_ref,               # (D, D) bf16 (pre-scaled by 1/sqrt(dh)), (1, D) f32
    wkv_ref, bkv_ref,             # (D, 2D) bf16 fused K|V, (1, 2D) f32
    wo_ref, bo_ref,               # (D, D) bf16, (1, D) f32
    ln2_g_ref, ln2_b_ref,         # (1, D) f32
    w1_ref, b1_ref,               # (D, F) bf16, (1, F) f32
    w2_ref, b2_ref,               # (F, D) bf16, (1, D) f32
    out_ref,                      # (1, TQ, D) f32
    *, num_heads: int, tq: int,
):
    f32 = jnp.float32
    bf16 = jnp.bfloat16
    eps = 1e-5

    x_full = seq_ref[0]                       # (S, D) f32
    S, D = x_full.shape
    dh = D // num_heads

    # ---------------- LayerNorm 1 over the full sequence (K/V need all rows)
    mu = jnp.mean(x_full, axis=-1, keepdims=True)
    var = jnp.mean((x_full - mu) ** 2, axis=-1, keepdims=True)
    xn_full = (x_full - mu) * jax.lax.rsqrt(var + eps)
    xn_full = xn_full * ln1_g_ref[0] + ln1_b_ref[0]          # f32
    xn_full_b = xn_full.astype(bf16)

    # Query-tile rows (raw for residual, normalized for the Q projection).
    if tq == S:
        x_q = x_full
        xn_q_b = xn_full_b
    else:
        q_start = pl.multiple_of(pl.program_id(1) * tq, tq)
        x_q = jax.lax.dynamic_slice_in_dim(x_full, q_start, tq, axis=0)
        xn_q_b = jax.lax.dynamic_slice_in_dim(xn_full_b, q_start, tq, axis=0)

    # ---------------- Projections: Q on the tile, fused K|V on the full seq.
    q = jnp.dot(xn_q_b, wq_ref[...], preferred_element_type=f32) + bq_ref[0]
    kv = jnp.dot(xn_full_b, wkv_ref[...], preferred_element_type=f32) + bkv_ref[0]

    q_b = q.astype(bf16)                      # (TQ, D), already scaled
    k_b = kv[:, :D].astype(bf16)              # (S, D)
    v_b = kv[:, D:].astype(bf16)              # (S, D)
    bias = bias_ref[0].astype(f32)            # (TQ, S)

    # ---------------- Attention: unrolled per head, no physical transposes.
    # TODO(synk): for very long S, switch the key axis to an online-softmax
    # (flash) accumulator over kv tiles instead of full-length keys.
    dn = (((1,), (1,)), ((), ()))             # contract last dims: A @ B^T
    ctx_parts = []
    for h in range(num_heads):
        sl = slice(h * dh, (h + 1) * dh)
        s = jax.lax.dot_general(q_b[:, sl], k_b[:, sl], dn,
                                preferred_element_type=f32)      # (TQ, S)
        s = s + bias
        m = jnp.max(s, axis=-1, keepdims=True)
        p = jnp.exp(s - m)
        p = p * pl.reciprocal(jnp.sum(p, axis=-1, keepdims=True), approx=True)
        ctx_parts.append(
            jnp.dot(p.astype(bf16), v_b[:, sl], preferred_element_type=f32))
    ctx = jnp.concatenate(ctx_parts, axis=-1)                    # (TQ, D) f32

    attn_out = jnp.dot(ctx.astype(bf16), wo_ref[...],
                       preferred_element_type=f32) + bo_ref[0]
    x1 = x_q + attn_out            # residual (dropout == identity, eval mode)

    # ---------------- Feed-forward (pre-LN) on the query tile only.
    mu2 = jnp.mean(x1, axis=-1, keepdims=True)
    var2 = jnp.mean((x1 - mu2) ** 2, axis=-1, keepdims=True)
    xn2 = (x1 - mu2) * jax.lax.rsqrt(var2 + eps)
    xn2 = xn2 * ln2_g_ref[0] + ln2_b_ref[0]

    hid = jnp.dot(xn2.astype(bf16), w1_ref[...],
                  preferred_element_type=f32) + b1_ref[0]
    hid = jnp.maximum(hid, 0.0)                                  # ReLU
    ff = jnp.dot(hid.astype(bf16), w2_ref[...],
                 preferred_element_type=f32) + b2_ref[0]

    out_ref[0] = (x1 + ff).astype(out_ref.dtype)


# -----------------------------------------------------------------------------
# Wrapper
# -----------------------------------------------------------------------------
def _pick_tq(S):
    if S <= 128:
        return S
    for cand in (128, 64, 32, 16, 8):
        if S % cand == 0:
            return cand
    return S


def encoder_layer(seq, mask, params, num_heads):
    B, S, D = seq.shape
    dh = D // num_heads
    d_ff = params['w1'].shape[1]
    scale = 1.0 / math.sqrt(dh)

    tq = _pick_tq(S)
    n_qt = S // tq

    f32, bf16 = jnp.float32, jnp.bfloat16

    # Parameter prep (once, outside the kernel): fold the attention scale into
    # Wq/bq, fuse K|V, cast matmul weights to bf16 (biases/LN stay f32).
    wq = (params['wq'] * scale).astype(bf16)
    bq = (params['bq'] * scale).astype(f32)
    wkv = jnp.concatenate([params['wk'], params['wv']], axis=1).astype(bf16)
    bkv = jnp.concatenate([params['bk'], params['bv']], axis=1).astype(f32)

    flat = (
        params['ln1_g'].astype(f32), params['ln1_b'].astype(f32),
        wq, bq, wkv, bkv,
        params['wo'].astype(bf16), params['bo'].astype(f32),
        params['ln2_g'].astype(f32), params['ln2_b'].astype(f32),
        params['w1'].astype(bf16), params['b1'].astype(f32),
        params['w2'].astype(bf16), params['b2'].astype(f32),
    )

    # Additive attention bias (0 = attend, -1e9 = masked) in bf16.
    bias = jnp.where(mask == 0, -1e9, 0.0).astype(bf16)          # (B, S, S)

    def const_spec(p):
        shape = p.shape
        return pl.BlockSpec(shape, lambda b, qt: (0,) * len(shape),
                            pipeline_mode=pl.Buffered(1))

    param_specs = [const_spec(p) for p in flat]

    seq_spec = pl.BlockSpec((1, S, D), lambda b, qt: (b, 0, 0))
    bias_spec = pl.BlockSpec((1, tq, S), lambda b, qt: (b, qt, 0))
    out_spec = pl.BlockSpec((1, tq, D), lambda b, qt: (b, qt, 0))

    # Rough VMEM budget: single-buffered weights + double-buffered I/O blocks
    # + live activations, with 2x margin, clamped to [16 MiB, 64 MiB].
    weight_bytes = sum(int(p.size) * p.dtype.itemsize for p in flat)
    io_bytes = 2 * (S * D * 4 + tq * S * 2 + tq * D * 4)
    act_bytes = 4 * (4 * S * D + 3 * S * D + 2 * tq * S
                     + 4 * tq * D + 2 * tq * d_ff)
    vmem_limit = int(min(max(2 * (weight_bytes + io_bytes + act_bytes),
                             16 << 20), 64 << 20))

    return pl.pallas_call(
        functools.partial(_encoder_layer_kernel, num_heads=num_heads, tq=tq),
        out_shape=jax.ShapeDtypeStruct((B, S, D), seq.dtype),
        grid=(B, n_qt),
        in_specs=[seq_spec, bias_spec] + param_specs,
        out_specs=out_spec,
        compiler_params=pltpu.CompilerParams(
            dimension_semantics=("parallel", "parallel"),
            vmem_limit_bytes=vmem_limit),
    )(seq.astype(f32), bias, *flat)


# -----------------------------------------------------------------------------
# Pure-JAX reference with the same numerics (bf16 MXU operands, f32 accum).
# -----------------------------------------------------------------------------
def encoder_layer_ref(seq, mask, p, num_heads):
    f32, bf16 = jnp.float32, jnp.bfloat16

    def mm(a, w):
        return jnp.dot(a.astype(bf16), w.astype(bf16),
                       preferred_element_type=f32)

    def ln(x, g, b):
        mu = jnp.mean(x, axis=-1, keepdims=True)
        var = jnp.mean((x - mu) ** 2, axis=-1, keepdims=True)
        return (x - mu) / jnp.sqrt(var + 1e-5) * g[0] + b[0]

    B, S, D = seq.shape
    dh = D // num_heads
    scale = 1.0 / math.sqrt(dh)

    xn = ln(seq, p['ln1_g'], p['ln1_b'])
    q = mm(xn, p['wq'] * scale) + p['bq'][0] * scale
    k = mm(xn, p['wk']) + p['bk'][0]
    v = mm(xn, p['wv']) + p['bv'][0]
    qh = q.reshape(B, S, num_heads, dh).transpose(0, 2, 1, 3).astype(bf16)
    kh = k.reshape(B, S, num_heads, dh).transpose(0, 2, 1, 3).astype(bf16)
    vh = v.reshape(B, S, num_heads, dh).transpose(0, 2, 1, 3).astype(bf16)
    scores = jnp.einsum('bhqd,bhkd->bhqk', qh, kh,
                        preferred_element_type=f32)
    scores = jnp.where(mask[:, None, :, :] == 0, scores - 1e9, scores)
    pr = jax.nn.softmax(scores, axis=-1)
    ctx = jnp.einsum('bhqk,bhkd->bhqd', pr.astype(bf16), vh,
                     preferred_element_type=f32)
    ctx = ctx.transpose(0, 2, 1, 3).reshape(B, S, D)
    x1 = seq + mm(ctx, p['wo']) + p['bo'][0]
    xn2 = ln(x1, p['ln2_g'], p['ln2_b'])
    hid = jnp.maximum(mm(xn2, p['w1']) + p['b1'][0], 0.0)
    ff = mm(hid, p['w2']) + p['b2'][0]
    return x1 + ff


# -----------------------------------------------------------------------------
# Main
# -----------------------------------------------------------------------------
if __name__ == "__main__":
    B, S, d_model, num_heads, d_ff = 2, 8, 32, 4, 64

    key = jax.random.PRNGKey(0)
    keys = jax.random.split(key, 16)

    def init_w(k, shape, fan_in):
        return jax.random.normal(k, shape, jnp.float32) / math.sqrt(fan_in)

    params = {
        'ln1_g': jnp.ones((1, d_model), jnp.float32),
        'ln1_b': jnp.zeros((1, d_model), jnp.float32),
        'wq': init_w(keys[0], (d_model, d_model), d_model),
        'bq': jnp.zeros((1, d_model), jnp.float32),
        'wk': init_w(keys[1], (d_model, d_model), d_model),
        'bk': jnp.zeros((1, d_model), jnp.float32),
        'wv': init_w(keys[2], (d_model, d_model), d_model),
        'bv': jnp.zeros((1, d_model), jnp.float32),
        'wo': init_w(keys[3], (d_model, d_model), d_model),
        'bo': 0.01 * jax.random.normal(keys[4], (1, d_model), jnp.float32),
        'ln2_g': jnp.ones((1, d_model), jnp.float32),
        'ln2_b': jnp.zeros((1, d_model), jnp.float32),
        'w1': init_w(keys[5], (d_model, d_ff), d_model),
        'b1': 0.01 * jax.random.normal(keys[6], (1, d_ff), jnp.float32),
        'w2': init_w(keys[7], (d_ff, d_model), d_ff),
        'b2': 0.01 * jax.random.normal(keys[8], (1, d_model), jnp.float32),
    }

    seq = jax.random.normal(keys[9], (B, S, d_model), jnp.float32)
    # mask: 1 = attend.  Mask out the last key position for batch element 1.
    mask = jnp.ones((B, S, S), jnp.float32)
    mask = mask.at[1, :, -1].set(0.0)

    out = encoder_layer(seq, mask, params, num_heads)
    out = jax.block_until_ready(out)

    ref = encoder_layer_ref(seq, mask, params, num_heads)
    assert out.shape == (B, S, d_model)
    # bf16 MXU operands in both kernel and reference; tolerance covers the
    # approximate-reciprocal softmax denominator and accumulation ordering.
    assert jnp.allclose(out, ref, atol=2e-2, rtol=2e-2), "mismatch vs reference"

    # TODO(synk): dropout is treated as identity (eval mode); training-mode
    # stochastic dropout would need pltpu.prng_* inside the kernel.
    print("KERNEL_OK")
</pallas_src>

<mosaic_0001>
module attributes {stable_mosaic.version = 11 : i64} {
  func.func @_encoder_layer_kernel(%arg0: i32, %arg1: i32, %arg2: memref<1x8x32xf32, #tpu.memory_space<vmem>>, %arg3: memref<1x8x8xbf16, #tpu.memory_space<vmem>>, %arg4: memref<1x32xf32, #tpu.memory_space<vmem>>, %arg5: memref<1x32xf32, #tpu.memory_space<vmem>>, %arg6: memref<32x32xbf16, #tpu.memory_space<vmem>>, %arg7: memref<1x32xf32, #tpu.memory_space<vmem>>, %arg8: memref<32x64xbf16, #tpu.memory_space<vmem>>, %arg9: memref<1x64xf32, #tpu.memory_space<vmem>>, %arg10: memref<32x32xbf16, #tpu.memory_space<vmem>>, %arg11: memref<1x32xf32, #tpu.memory_space<vmem>>, %arg12: memref<1x32xf32, #tpu.memory_space<vmem>>, %arg13: memref<1x32xf32, #tpu.memory_space<vmem>>, %arg14: memref<32x64xbf16, #tpu.memory_space<vmem>>, %arg15: memref<1x64xf32, #tpu.memory_space<vmem>>, %arg16: memref<64x32xbf16, #tpu.memory_space<vmem>>, %arg17: memref<1x32xf32, #tpu.memory_space<vmem>>, %arg18: memref<1x8x32xf32, #tpu.memory_space<vmem>>) attributes {dimension_semantics = [#tpu.dimension_semantics<parallel>, #tpu.dimension_semantics<parallel>], iteration_bounds = array<i64: 2, 1>, scalar_prefetch = 0 : i64, scratch_operands = 0 : i64, tpu.core_type = #tpu.core_type<tc>, window_params = [{transform_indices = @transform_0, window_bounds = array<i64: 1, 8, 32>}, {transform_indices = @transform_1, window_bounds = array<i64: 1, 8, 8>}, {pipeline_mode = #tpu.pipeline_mode<synchronous>, transform_indices = @transform_2, window_bounds = array<i64: 1, 32>}, {pipeline_mode = #tpu.pipeline_mode<synchronous>, transform_indices = @transform_3, window_bounds = array<i64: 1, 32>}, {pipeline_mode = #tpu.pipeline_mode<synchronous>, transform_indices = @transform_4, window_bounds = array<i64: 32, 32>}, {pipeline_mode = #tpu.pipeline_mode<synchronous>, transform_indices = @transform_5, window_bounds = array<i64: 1, 32>}, {pipeline_mode = #tpu.pipeline_mode<synchronous>, transform_indices = @transform_6, window_bounds = array<i64: 32, 64>}, {pipeline_mode = #tpu.pipeline_mode<synchronous>, transform_indices = @transform_7, window_bounds = array<i64: 1, 64>}, {pipeline_mode = #tpu.pipeline_mode<synchronous>, transform_indices = @transform_8, window_bounds = array<i64: 32, 32>}, {pipeline_mode = #tpu.pipeline_mode<synchronous>, transform_indices = @transform_9, window_bounds = array<i64: 1, 32>}, {pipeline_mode = #tpu.pipeline_mode<synchronous>, transform_indices = @transform_10, window_bounds = array<i64: 1, 32>}, {pipeline_mode = #tpu.pipeline_mode<synchronous>, transform_indices = @transform_11, window_bounds = array<i64: 1, 32>}, {pipeline_mode = #tpu.pipeline_mode<synchronous>, transform_indices = @transform_12, window_bounds = array<i64: 32, 64>}, {pipeline_mode = #tpu.pipeline_mode<synchronous>, transform_indices = @transform_13, window_bounds = array<i64: 1, 64>}, {pipeline_mode = #tpu.pipeline_mode<synchronous>, transform_indices = @transform_14, window_bounds = array<i64: 64, 32>}, {pipeline_mode = #tpu.pipeline_mode<synchronous>, transform_indices = @transform_15, window_bounds = array<i64: 1, 32>}, {transform_indices = @transform_16, window_bounds = array<i64: 1, 8, 32>}]} {
    %c0 = arith.constant 0 : index
    %c0_0 = arith.constant 0 : index
    %c0_1 = arith.constant 0 : index
    %0 = vector.load %arg2[%c0, %c0_0, %c0_1] : memref<1x8x32xf32, #tpu.memory_space<vmem>>, vector<1x8x32xf32>
    %1 = vector.shape_cast %0 : vector<1x8x32xf32> to vector<8x32xf32>
    %cst = arith.constant dense<0.000000e+00> : vector<8xf32>
    %2 = vector.multi_reduction <add>, %1, %cst [1] : vector<8x32xf32> to vector<8xf32>
    %3 = vector.shape_cast %2 : vector<8xf32> to vector<8x1xf32>
    %cst_2 = arith.constant 3.200000e+01 : f32
    %4 = vector.broadcast %cst_2 : f32 to vector<8x1xf32>
    %5 = arith.divf %3, %4 : vector<8x1xf32>
    %6 = vector.broadcast %5 : vector<8x1xf32> to vector<8x32xf32>
    %7 = arith.subf %1, %6 : vector<8x32xf32>
    %8 = arith.mulf %7, %7 : vector<8x32xf32>
    %cst_3 = arith.constant dense<0.000000e+00> : vector<8xf32>
    %9 = vector.multi_reduction <add>, %8, %cst_3 [1] : vector<8x32xf32> to vector<8xf32>
    %10 = vector.shape_cast %9 : vector<8xf32> to vector<8x1xf32>
    %cst_4 = arith.constant 3.200000e+01 : f32
    %11 = vector.broadcast %cst_4 : f32 to vector<8x1xf32>
    %12 = arith.divf %10, %11 : vector<8x1xf32>
    %13 = vector.broadcast %5 : vector<8x1xf32> to vector<8x32xf32>
    %14 = arith.subf %1, %13 : vector<8x32xf32>
    %cst_5 = arith.constant 9.99999974E-6 : f32
    %15 = vector.broadcast %cst_5 : f32 to vector<8x1xf32>
    %16 = arith.addf %12, %15 : vector<8x1xf32>
    %17 = math.rsqrt %16 : vector<8x1xf32>
    %18 = vector.broadcast %17 : vector<8x1xf32> to vector<8x32xf32>
    %19 = arith.mulf %14, %18 : vector<8x32xf32>
    %c0_6 = arith.constant 0 : index
    %c0_7 = arith.constant 0 : index
    %20 = vector.load %arg4[%c0_6, %c0_7] : memref<1x32xf32, #tpu.memory_space<vmem>>, vector<1x32xf32>
    %21 = vector.shape_cast %20 : vector<1x32xf32> to vector<32xf32>
    %22 = vector.shape_cast %21 : vector<32xf32> to vector<1x32xf32>
    %23 = vector.broadcast %22 : vector<1x32xf32> to vector<8x32xf32>
    %24 = arith.mulf %19, %23 : vector<8x32xf32>
    %c0_8 = arith.constant 0 : index
    %c0_9 = arith.constant 0 : index
    %25 = vector.load %arg5[%c0_8, %c0_9] : memref<1x32xf32, #tpu.memory_space<vmem>>, vector<1x32xf32>
    %26 = vector.shape_cast %25 : vector<1x32xf32> to vector<32xf32>
    %27 = vector.shape_cast %26 : vector<32xf32> to vector<1x32xf32>
    %28 = vector.broadcast %27 : vector<1x32xf32> to vector<8x32xf32>
    %29 = arith.addf %24, %28 : vector<8x32xf32>
    %30 = arith.truncf %29 : vector<8x32xf32> to vector<8x32xbf16>
    %c0_10 = arith.constant 0 : index
    %c0_11 = arith.constant 0 : index
    %31 = vector.load %arg6[%c0_10, %c0_11] : memref<32x32xbf16, #tpu.memory_space<vmem>>, vector<32x32xbf16>
    %cst_12 = arith.constant dense<0.000000e+00> : vector<8x32xf32>
    %32 = tpu.matmul %30, %31, %cst_12 {dimension_numbers = #tpu.dot_dimension_numbers<[1], [0], [0], [1], [0, 0, 1, 1], [], []>} : vector<8x32xbf16>, vector<32x32xbf16>, vector<8x32xf32> -> vector<8x32xf32>
    %c0_13 = arith.constant 0 : index
    %c0_14 = arith.constant 0 : index
    %33 = vector.load %arg7[%c0_13, %c0_14] : memref<1x32xf32, #tpu.memory_space<vmem>>, vector<1x32xf32>
    %34 = vector.shape_cast %33 : vector<1x32xf32> to vector<32xf32>
    %35 = vector.shape_cast %34 : vector<32xf32> to vector<1x32xf32>
    %36 = vector.broadcast %35 : vector<1x32xf32> to vector<8x32xf32>
    %37 = arith.addf %32, %36 : vector<8x32xf32>
    %c0_15 = arith.constant 0 : index
    %c0_16 = arith.constant 0 : index
    %38 = vector.load %arg8[%c0_15, %c0_16] : memref<32x64xbf16, #tpu.memory_space<vmem>>, vector<32x64xbf16>
    %cst_17 = arith.constant dense<0.000000e+00> : vector<8x64xf32>
    %39 = tpu.matmul %30, %38, %cst_17 {dimension_numbers = #tpu.dot_dimension_numbers<[1], [0], [0], [1], [0, 0, 1, 1], [], []>} : vector<8x32xbf16>, vector<32x64xbf16>, vector<8x64xf32> -> vector<8x64xf32>
    %c0_18 = arith.constant 0 : index
    %c0_19 = arith.constant 0 : index
    %40 = vector.load %arg9[%c0_18, %c0_19] : memref<1x64xf32, #tpu.memory_space<vmem>>, vector<1x64xf32>
    %41 = vector.shape_cast %40 : vector<1x64xf32> to vector<64xf32>
    %42 = vector.shape_cast %41 : vector<64xf32> to vector<1x64xf32>
    %43 = vector.broadcast %42 : vector<1x64xf32> to vector<8x64xf32>
    %44 = arith.addf %39, %43 : vector<8x64xf32>
    %45 = arith.truncf %37 : vector<8x32xf32> to vector<8x32xbf16>
    %46 = vector.extract_strided_slice %44 {offsets = [0, 0], sizes = [8, 32], strides = [1, 1]} : vector<8x64xf32> to vector<8x32xf32>
    %47 = arith.truncf %46 : vector<8x32xf32> to vector<8x32xbf16>
    %48 = vector.extract_strided_slice %44 {offsets = [0, 32], sizes = [8, 32], strides = [1, 1]} : vector<8x64xf32> to vector<8x32xf32>
    %49 = arith.truncf %48 : vector<8x32xf32> to vector<8x32xbf16>
    %c0_20 = arith.constant 0 : index
    %c0_21 = arith.constant 0 : index
    %c0_22 = arith.constant 0 : index
    %50 = vector.load %arg3[%c0_20, %c0_21, %c0_22] : memref<1x8x8xbf16, #tpu.memory_space<vmem>>, vector<1x8x8xbf16>
    %51 = vector.shape_cast %50 : vector<1x8x8xbf16> to vector<8x8xbf16>
    %52 = arith.extf %51 : vector<8x8xbf16> to vector<8x8xf32>
    %53 = vector.extract_strided_slice %45 {offsets = [0, 0], sizes = [8, 8], strides = [1, 1]} : vector<8x32xbf16> to vector<8x8xbf16>
    %54 = vector.extract_strided_slice %47 {offsets = [0, 0], sizes = [8, 8], strides = [1, 1]} : vector<8x32xbf16> to vector<8x8xbf16>
    %cst_23 = arith.constant dense<0.000000e+00> : vector<8x8xf32>
    %55 = tpu.matmul %53, %54, %cst_23 {dimension_numbers = #tpu.dot_dimension_numbers<[1], [1], [0], [0], [0, 0, 1, 0], [], []>} : vector<8x8xbf16>, vector<8x8xbf16>, vector<8x8xf32> -> vector<8x8xf32>
    %56 = arith.addf %55, %52 : vector<8x8xf32>
    %cst_24 = arith.constant dense<0xFF800000> : vector<8xf32>
    %57 = vector.multi_reduction <maximumf>, %56, %cst_24 [1] : vector<8x8xf32> to vector<8xf32>
    %58 = vector.shape_cast %57 : vector<8xf32> to vector<8x1xf32>
    %59 = vector.broadcast %58 : vector<8x1xf32> to vector<8x8xf32>
    %60 = arith.subf %56, %59 : vector<8x8xf32>
    %61 = math.exp %60 : vector<8x8xf32>
    %cst_25 = arith.constant dense<0.000000e+00> : vector<8xf32>
    %62 = vector.multi_reduction <add>, %61, %cst_25 [1] : vector<8x8xf32> to vector<8xf32>
    %63 = vector.shape_cast %62 : vector<8xf32> to vector<8x1xf32>
    %64 = tpu.reciprocal %63 {approx = true} : vector<8x1xf32> -> vector<8x1xf32>
    %65 = vector.broadcast %64 : vector<8x1xf32> to vector<8x8xf32>
    %66 = arith.mulf %61, %65 : vector<8x8xf32>
    %67 = arith.truncf %66 : vector<8x8xf32> to vector<8x8xbf16>
    %68 = vector.extract_strided_slice %49 {offsets = [0, 0], sizes = [8, 8], strides = [1, 1]} : vector<8x32xbf16> to vector<8x8xbf16>
    %cst_26 = arith.constant dense<0.000000e+00> : vector<8x8xf32>
    %69 = tpu.matmul %67, %68, %cst_26 {dimension_numbers = #tpu.dot_dimension_numbers<[1], [0], [0], [1], [0, 0, 1, 1], [], []>} : vector<8x8xbf16>, vector<8x8xbf16>, vector<8x8xf32> -> vector<8x8xf32>
    %70 = vector.extract_strided_slice %45 {offsets = [0, 8], sizes = [8, 8], strides = [1, 1]} : vector<8x32xbf16> to vector<8x8xbf16>
    %71 = vector.extract_strided_slice %47 {offsets = [0, 8], sizes = [8, 8], strides = [1, 1]} : vector<8x32xbf16> to vector<8x8xbf16>
    %cst_27 = arith.constant dense<0.000000e+00> : vector<8x8xf32>
    %72 = tpu.matmul %70, %71, %cst_27 {dimension_numbers = #tpu.dot_dimension_numbers<[1], [1], [0], [0], [0, 0, 1, 0], [], []>} : vector<8x8xbf16>, vector<8x8xbf16>, vector<8x8xf32> -> vector<8x8xf32>
    %73 = arith.addf %72, %52 : vector<8x8xf32>
    %cst_28 = arith.constant dense<0xFF800000> : vector<8xf32>
    %74 = vector.multi_reduction <maximumf>, %73, %cst_28 [1] : vector<8x8xf32> to vector<8xf32>
    %75 = vector.shape_cast %74 : vector<8xf32> to vector<8x1xf32>
    %76 = vector.broadcast %75 : vector<8x1xf32> to vector<8x8xf32>
    %77 = arith.subf %73, %76 : vector<8x8xf32>
    %78 = math.exp %77 : vector<8x8xf32>
    %cst_29 = arith.constant dense<0.000000e+00> : vector<8xf32>
    %79 = vector.multi_reduction <add>, %78, %cst_29 [1] : vector<8x8xf32> to vector<8xf32>
    %80 = vector.shape_cast %79 : vector<8xf32> to vector<8x1xf32>
    %81 = tpu.reciprocal %80 {approx = true} : vector<8x1xf32> -> vector<8x1xf32>
    %82 = vector.broadcast %81 : vector<8x1xf32> to vector<8x8xf32>
    %83 = arith.mulf %78, %82 : vector<8x8xf32>
    %84 = arith.truncf %83 : vector<8x8xf32> to vector<8x8xbf16>
    %85 = vector.extract_strided_slice %49 {offsets = [0, 8], sizes = [8, 8], strides = [1, 1]} : vector<8x32xbf16> to vector<8x8xbf16>
    %cst_30 = arith.constant dense<0.000000e+00> : vector<8x8xf32>
    %86 = tpu.matmul %84, %85, %cst_30 {dimension_numbers = #tpu.dot_dimension_numbers<[1], [0], [0], [1], [0, 0, 1, 1], [], []>} : vector<8x8xbf16>, vector<8x8xbf16>, vector<8x8xf32> -> vector<8x8xf32>
    %87 = vector.extract_strided_slice %45 {offsets = [0, 16], sizes = [8, 8], strides = [1, 1]} : vector<8x32xbf16> to vector<8x8xbf16>
    %88 = vector.extract_strided_slice %47 {offsets = [0, 16], sizes = [8, 8], strides = [1, 1]} : vector<8x32xbf16> to vector<8x8xbf16>
    %cst_31 = arith.constant dense<0.000000e+00> : vector<8x8xf32>
    %89 = tpu.matmul %87, %88, %cst_31 {dimension_numbers = #tpu.dot_dimension_numbers<[1], [1], [0], [0], [0, 0, 1, 0], [], []>} : vector<8x8xbf16>, vector<8x8xbf16>, vector<8x8xf32> -> vector<8x8xf32>
    %90 = arith.addf %89, %52 : vector<8x8xf32>
    %cst_32 = arith.constant dense<0xFF800000> : vector<8xf32>
    %91 = vector.multi_reduction <maximumf>, %90, %cst_32 [1] : vector<8x8xf32> to vector<8xf32>
    %92 = vector.shape_cast %91 : vector<8xf32> to vector<8x1xf32>
    %93 = vector.broadcast %92 : vector<8x1xf32> to vector<8x8xf32>
    %94 = arith.subf %90, %93 : vector<8x8xf32>
    %95 = math.exp %94 : vector<8x8xf32>
    %cst_33 = arith.constant dense<0.000000e+00> : vector<8xf32>
    %96 = vector.multi_reduction <add>, %95, %cst_33 [1] : vector<8x8xf32> to vector<8xf32>
    %97 = vector.shape_cast %96 : vector<8xf32> to vector<8x1xf32>
    %98 = tpu.reciprocal %97 {approx = true} : vector<8x1xf32> -> vector<8x1xf32>
    %99 = vector.broadcast %98 : vector<8x1xf32> to vector<8x8xf32>
    %100 = arith.mulf %95, %99 : vector<8x8xf32>
    %101 = arith.truncf %100 : vector<8x8xf32> to vector<8x8xbf16>
    %102 = vector.extract_strided_slice %49 {offsets = [0, 16], sizes = [8, 8], strides = [1, 1]} : vector<8x32xbf16> to vector<8x8xbf16>
    %cst_34 = arith.constant dense<0.000000e+00> : vector<8x8xf32>
    %103 = tpu.matmul %101, %102, %cst_34 {dimension_numbers = #tpu.dot_dimension_numbers<[1], [0], [0], [1], [0, 0, 1, 1], [], []>} : vector<8x8xbf16>, vector<8x8xbf16>, vector<8x8xf32> -> vector<8x8xf32>
    %104 = vector.extract_strided_slice %45 {offsets = [0, 24], sizes = [8, 8], strides = [1, 1]} : vector<8x32xbf16> to vector<8x8xbf16>
    %105 = vector.extract_strided_slice %47 {offsets = [0, 24], sizes = [8, 8], strides = [1, 1]} : vector<8x32xbf16> to vector<8x8xbf16>
    %cst_35 = arith.constant dense<0.000000e+00> : vector<8x8xf32>
    %106 = tpu.matmul %104, %105, %cst_35 {dimension_numbers = #tpu.dot_dimension_numbers<[1], [1], [0], [0], [0, 0, 1, 0], [], []>} : vector<8x8xbf16>, vector<8x8xbf16>, vector<8x8xf32> -> vector<8x8xf32>
    %107 = arith.addf %106, %52 : vector<8x8xf32>
    %cst_36 = arith.constant dense<0xFF800000> : vector<8xf32>
    %108 = vector.multi_reduction <maximumf>, %107, %cst_36 [1] : vector<8x8xf32> to vector<8xf32>
    %109 = vector.shape_cast %108 : vector<8xf32> to vector<8x1xf32>
    %110 = vector.broadcast %109 : vector<8x1xf32> to vector<8x8xf32>
    %111 = arith.subf %107, %110 : vector<8x8xf32>
    %112 = math.exp %111 : vector<8x8xf32>
    %cst_37 = arith.constant dense<0.000000e+00> : vector<8xf32>
    %113 = vector.multi_reduction <add>, %112, %cst_37 [1] : vector<8x8xf32> to vector<8xf32>
    %114 = vector.shape_cast %113 : vector<8xf32> to vector<8x1xf32>
    %115 = tpu.reciprocal %114 {approx = true} : vector<8x1xf32> -> vector<8x1xf32>
    %116 = vector.broadcast %115 : vector<8x1xf32> to vector<8x8xf32>
    %117 = arith.mulf %112, %116 : vector<8x8xf32>
    %118 = arith.truncf %117 : vector<8x8xf32> to vector<8x8xbf16>
    %119 = vector.extract_strided_slice %49 {offsets = [0, 24], sizes = [8, 8], strides = [1, 1]} : vector<8x32xbf16> to vector<8x8xbf16>
    %cst_38 = arith.constant dense<0.000000e+00> : vector<8x8xf32>
    %120 = tpu.matmul %118, %119, %cst_38 {dimension_numbers = #tpu.dot_dimension_numbers<[1], [0], [0], [1], [0, 0, 1, 1], [], []>} : vector<8x8xbf16>, vector<8x8xbf16>, vector<8x8xf32> -> vector<8x8xf32>
    %121 = tpu.concatenate %69, %86, %103, %120 in 1 : vector<8x8xf32>, vector<8x8xf32>, vector<8x8xf32>, vector<8x8xf32> -> vector<8x32xf32>
    %122 = arith.truncf %121 : vector<8x32xf32> to vector<8x32xbf16>
    %c0_39 = arith.constant 0 : index
    %c0_40 = arith.constant 0 : index
    %123 = vector.load %arg10[%c0_39, %c0_40] : memref<32x32xbf16, #tpu.memory_space<vmem>>, vector<32x32xbf16>
    %cst_41 = arith.constant dense<0.000000e+00> : vector<8x32xf32>
    %124 = tpu.matmul %122, %123, %cst_41 {dimension_numbers = #tpu.dot_dimension_numbers<[1], [0], [0], [1], [0, 0, 1, 1], [], []>} : vector<8x32xbf16>, vector<32x32xbf16>, vector<8x32xf32> -> vector<8x32xf32>
    %c0_42 = arith.constant 0 : index
    %c0_43 = arith.constant 0 : index
    %125 = vector.load %arg11[%c0_42, %c0_43] : memref<1x32xf32, #tpu.memory_space<vmem>>, vector<1x32xf32>
    %126 = vector.shape_cast %125 : vector<1x32xf32> to vector<32xf32>
    %127 = vector.shape_cast %126 : vector<32xf32> to vector<1x32xf32>
    %128 = vector.broadcast %127 : vector<1x32xf32> to vector<8x32xf32>
    %129 = arith.addf %124, %128 : vector<8x32xf32>
    %130 = arith.addf %1, %129 : vector<8x32xf32>
    %cst_44 = arith.constant dense<0.000000e+00> : vector<8xf32>
    %131 = vector.multi_reduction <add>, %130, %cst_44 [1] : vector<8x32xf32> to vector<8xf32>
    %132 = vector.shape_cast %131 : vector<8xf32> to vector<8x1xf32>
    %cst_45 = arith.constant 3.200000e+01 : f32
    %133 = vector.broadcast %cst_45 : f32 to vector<8x1xf32>
    %134 = arith.divf %132, %133 : vector<8x1xf32>
    %135 = vector.broadcast %134 : vector<8x1xf32> to vector<8x32xf32>
    %136 = arith.subf %130, %135 : vector<8x32xf32>
    %137 = arith.mulf %136, %136 : vector<8x32xf32>
    %cst_46 = arith.constant dense<0.000000e+00> : vector<8xf32>
    %138 = vector.multi_reduction <add>, %137, %cst_46 [1] : vector<8x32xf32> to vector<8xf32>
    %139 = vector.shape_cast %138 : vector<8xf32> to vector<8x1xf32>
    %cst_47 = arith.constant 3.200000e+01 : f32
    %140 = vector.broadcast %cst_47 : f32 to vector<8x1xf32>
    %141 = arith.divf %139, %140 : vector<8x1xf32>
    %142 = vector.broadcast %134 : vector<8x1xf32> to vector<8x32xf32>
    %143 = arith.subf %130, %142 : vector<8x32xf32>
    %cst_48 = arith.constant 9.99999974E-6 : f32
    %144 = vector.broadcast %cst_48 : f32 to vector<8x1xf32>
    %145 = arith.addf %141, %144 : vector<8x1xf32>
    %146 = math.rsqrt %145 : vector<8x1xf32>
    %147 = vector.broadcast %146 : vector<8x1xf32> to vector<8x32xf32>
    %148 = arith.mulf %143, %147 : vector<8x32xf32>
    %c0_49 = arith.constant 0 : index
    %c0_50 = arith.constant 0 : index
    %149 = vector.load %arg12[%c0_49, %c0_50] : memref<1x32xf32, #tpu.memory_space<vmem>>, vector<1x32xf32>
    %150 = vector.shape_cast %149 : vector<1x32xf32> to vector<32xf32>
    %151 = vector.shape_cast %150 : vector<32xf32> to vector<1x32xf32>
    %152 = vector.broadcast %151 : vector<1x32xf32> to vector<8x32xf32>
    %153 = arith.mulf %148, %152 : vector<8x32xf32>
    %c0_51 = arith.constant 0 : index
    %c0_52 = arith.constant 0 : index
    %154 = vector.load %arg13[%c0_51, %c0_52] : memref<1x32xf32, #tpu.memory_space<vmem>>, vector<1x32xf32>
    %155 = vector.shape_cast %154 : vector<1x32xf32> to vector<32xf32>
    %156 = vector.shape_cast %155 : vector<32xf32> to vector<1x32xf32>
    %157 = vector.broadcast %156 : vector<1x32xf32> to vector<8x32xf32>
    %158 = arith.addf %153, %157 : vector<8x32xf32>
    %159 = arith.truncf %158 : vector<8x32xf32> to vector<8x32xbf16>
    %c0_53 = arith.constant 0 : index
    %c0_54 = arith.constant 0 : index
    %160 = vector.load %arg14[%c0_53, %c0_54] : memref<32x64xbf16, #tpu.memory_space<vmem>>, vector<32x64xbf16>
    %cst_55 = arith.constant dense<0.000000e+00> : vector<8x64xf32>
    %161 = tpu.matmul %159, %160, %cst_55 {dimension_numbers = #tpu.dot_dimension_numbers<[1], [0], [0], [1], [0, 0, 1, 1], [], []>} : vector<8x32xbf16>, vector<32x64xbf16>, vector<8x64xf32> -> vector<8x64xf32>
    %c0_56 = arith.constant 0 : index
    %c0_57 = arith.constant 0 : index
    %162 = vector.load %arg15[%c0_56, %c0_57] : memref<1x64xf32, #tpu.memory_space<vmem>>, vector<1x64xf32>
    %163 = vector.shape_cast %162 : vector<1x64xf32> to vector<64xf32>
    %164 = vector.shape_cast %163 : vector<64xf32> to vector<1x64xf32>
    %165 = vector.broadcast %164 : vector<1x64xf32> to vector<8x64xf32>
    %166 = arith.addf %161, %165 : vector<8x64xf32>
    %cst_58 = arith.constant 0.000000e+00 : f32
    %167 = vector.broadcast %cst_58 : f32 to vector<8x64xf32>
    %168 = arith.maximumf %166, %167 : vector<8x64xf32>
    %169 = arith.truncf %168 : vector<8x64xf32> to vector<8x64xbf16>
    %c0_59 = arith.constant 0 : index
    %c0_60 = arith.constant 0 : index
    %170 = vector.load %arg16[%c0_59, %c0_60] : memref<64x32xbf16, #tpu.memory_space<vmem>>, vector<64x32xbf16>
    %cst_61 = arith.constant dense<0.000000e+00> : vector<8x32xf32>
    %171 = tpu.matmul %169, %170, %cst_61 {dimension_numbers = #tpu.dot_dimension_numbers<[1], [0], [0], [1], [0, 0, 1, 1], [], []>} : vector<8x64xbf16>, vector<64x32xbf16>, vector<8x32xf32> -> vector<8x32xf32>
    %c0_62 = arith.constant 0 : index
    %c0_63 = arith.constant 0 : index
    %172 = vector.load %arg17[%c0_62, %c0_63] : memref<1x32xf32, #tpu.memory_space<vmem>>, vector<1x32xf32>
    %173 = vector.shape_cast %172 : vector<1x32xf32> to vector<32xf32>
    %174 = vector.shape_cast %173 : vector<32xf32> to vector<1x32xf32>
    %175 = vector.broadcast %174 : vector<1x32xf32> to vector<8x32xf32>
    %176 = arith.addf %171, %175 : vector<8x32xf32>
    %177 = arith.addf %130, %176 : vector<8x32xf32>
    %c0_64 = arith.constant 0 : index
    %c0_65 = arith.constant 0 : index
    %c0_66 = arith.constant 0 : index
    %178 = vector.load %arg18[%c0_64, %c0_65, %c0_66] : memref<1x8x32xf32, #tpu.memory_space<vmem>>, vector<1x8x32xf32>
    %179 = vector.shape_cast %178 : vector<1x8x32xf32> to vector<8x32xf32>
    %180 = vector.shape_cast %177 : vector<8x32xf32> to vector<1x8x32xf32>
    tpu.vector_store %arg18[%c0_64, %c0_65, %c0_66], %180 {strides = array<i32>} : memref<1x8x32xf32, #tpu.memory_space<vmem>>, vector<1x8x32xf32>,
    return
  }
  func.func @transform_0(%arg0: i32, %arg1: i32) -> (i32, i32, i32) {
    %c0_i32 = arith.constant 0 : i32
    %c0_i32_0 = arith.constant 0 : i32
    %c0_i32_1 = arith.constant 0 : i32
    return %arg0, %c0_i32, %c0_i32_0 : i32, i32, i32
  }
  func.func @transform_1(%arg0: i32, %arg1: i32) -> (i32, i32, i32) {
    %c0_i32 = arith.constant 0 : i32
    %c0_i32_0 = arith.constant 0 : i32
    return %arg0, %arg1, %c0_i32 : i32, i32, i32
  }
  func.func @transform_2(%arg0: i32, %arg1: i32) -> (i32, i32) {
    %c0_i32 = arith.constant 0 : i32
    %c0_i32_0 = arith.constant 0 : i32
    %c0_i32_1 = arith.constant 0 : i32
    return %c0_i32, %c0_i32_0 : i32, i32
  }
  func.func @transform_3(%arg0: i32, %arg1: i32) -> (i32, i32) {
    %c0_i32 = arith.constant 0 : i32
    %c0_i32_0 = arith.constant 0 : i32
    %c0_i32_1 = arith.constant 0 : i32
    return %c0_i32, %c0_i32_0 : i32, i32
  }
  func.func @transform_4(%arg0: i32, %arg1: i32) -> (i32, i32) {
    %c0_i32 = arith.constant 0 : i32
    %c0_i32_0 = arith.constant 0 : i32
    %c0_i32_1 = arith.constant 0 : i32
    return %c0_i32, %c0_i32_0 : i32, i32
  }
  func.func @transform_5(%arg0: i32, %arg1: i32) -> (i32, i32) {
    %c0_i32 = arith.constant 0 : i32
    %c0_i32_0 = arith.constant 0 : i32
    %c0_i32_1 = arith.constant 0 : i32
    return %c0_i32, %c0_i32_0 : i32, i32
  }
  func.func @transform_6(%arg0: i32, %arg1: i32) -> (i32, i32) {
    %c0_i32 = arith.constant 0 : i32
    %c0_i32_0 = arith.constant 0 : i32
    %c0_i32_1 = arith.constant 0 : i32
    return %c0_i32, %c0_i32_0 : i32, i32
  }
  func.func @transform_7(%arg0: i32, %arg1: i32) -> (i32, i32) {
    %c0_i32 = arith.constant 0 : i32
    %c0_i32_0 = arith.constant 0 : i32
    %c0_i32_1 = arith.constant 0 : i32
    return %c0_i32, %c0_i32_0 : i32, i32
  }
  func.func @transform_8(%arg0: i32, %arg1: i32) -> (i32, i32) {
    %c0_i32 = arith.constant 0 : i32
    %c0_i32_0 = arith.constant 0 : i32
    %c0_i32_1 = arith.constant 0 : i32
    return %c0_i32, %c0_i32_0 : i32, i32
  }
  func.func @transform_9(%arg0: i32, %arg1: i32) -> (i32, i32) {
    %c0_i32 = arith.constant 0 : i32
    %c0_i32_0 = arith.constant 0 : i32
    %c0_i32_1 = arith.constant 0 : i32
    return %c0_i32, %c0_i32_0 : i32, i32
  }
  func.func @transform_10(%arg0: i32, %arg1: i32) -> (i32, i32) {
    %c0_i32 = arith.constant 0 : i32
    %c0_i32_0 = arith.constant 0 : i32
    %c0_i32_1 = arith.constant 0 : i32
    return %c0_i32, %c0_i32_0 : i32, i32
  }
  func.func @transform_11(%arg0: i32, %arg1: i32) -> (i32, i32) {
    %c0_i32 = arith.constant 0 : i32
    %c0_i32_0 = arith.constant 0 : i32
    %c0_i32_1 = arith.constant 0 : i32
    return %c0_i32, %c0_i32_0 : i32, i32
  }
  func.func @transform_12(%arg0: i32, %arg1: i32) -> (i32, i32) {
    %c0_i32 = arith.constant 0 : i32
    %c0_i32_0 = arith.constant 0 : i32
    %c0_i32_1 = arith.constant 0 : i32
    return %c0_i32, %c0_i32_0 : i32, i32
  }
  func.func @transform_13(%arg0: i32, %arg1: i32) -> (i32, i32) {
    %c0_i32 = arith.constant 0 : i32
    %c0_i32_0 = arith.constant 0 : i32
    %c0_i32_1 = arith.constant 0 : i32
    return %c0_i32, %c0_i32_0 : i32, i32
  }
  func.func @transform_14(%arg0: i32, %arg1: i32) -> (i32, i32) {
    %c0_i32 = arith.constant 0 : i32
    %c0_i32_0 = arith.constant 0 : i32
    %c0_i32_1 = arith.constant 0 : i32
    return %c0_i32, %c0_i32_0 : i32, i32
  }
  func.func @transform_15(%arg0: i32, %arg1: i32) -> (i32, i32) {
    %c0_i32 = arith.constant 0 : i32
    %c0_i32_0 = arith.constant 0 : i32
    %c0_i32_1 = arith.constant 0 : i32
    return %c0_i32, %c0_i32_0 : i32, i32
  }
  func.func @transform_16(%arg0: i32, %arg1: i32) -> (i32, i32, i32) {
    %c0_i32 = arith.constant 0 : i32
    %c0_i32_0 = arith.constant 0 : i32
    return %arg0, %arg1, %c0_i32 : i32, i32, i32
  }
}

</mosaic_0001>

<bundles_post_ra>
// kernel: tpu_custom_call.1
= control target key start
LH: loop header
LB: loop body
LE: loop exit
PB: predicated region body
PF: predicated region fallthrough
CT: control target
= control target key end

     0   :  { %s2752_s0 = inlined_call_operand.vmem [shape: f32[2,8,32], index: 0, kind: input, shape index: {}]   ;;  %s2753_s1 = inlined_call_operand.hbm [shape: bf16[2,8,8], index: 1, kind: input, shape index: {}]   ;;  %s2754_s2 = inlined_call_operand.vmem [shape: f32[1,32], index: 2, kind: input, shape index: {}]   ;;  %s2755_s3 = inlined_call_operand.vmem [shape: f32[1,32], index: 3, kind: input, shape index: {}]   ;;  %s2756_s4 = inlined_call_operand.vmem [shape: bf16[32,32], index: 4, kind: input, shape index: {}]   ;;  %s2757_s5 = inlined_call_operand.hbm [shape: f32[1,32], index: 5, kind: input, shape index: {}]   ;;  %s2758_s6 = inlined_call_operand.vmem [shape: bf16[32,64], index: 6, kind: input, shape index: {}]   ;;  %s2759_s7 = inlined_call_operand.hbm [shape: f32[1,64], index: 7, kind: input, shape index: {}]   ;;  %s2760_s8 = inlined_call_operand.hbm [shape: bf16[32,32], index: 8, kind: input, shape index: {}]   ;;  %s2761_s9 = inlined_call_operand.hbm [shape: f32[1,32], index: 9, kind: input, shape index: {}]   ;;  %s2762_s10 = inlined_call_operand.vmem [shape: f32[1,32], index: 10, kind: input, shape index: {}]   ;;  %s2763_s11 = inlined_call_operand.vmem [shape: f32[1,32], index: 11, kind: input, shape index: {}]   ;;  %s2764_s12 = inlined_call_operand.vmem [shape: bf16[32,64], index: 12, kind: input, shape index: {}]   ;;  %s2765_s13 = inlined_call_operand.vmem [shape: f32[1,64], index: 13, kind: input, shape index: {}]   ;;  %s2766_s14 = inlined_call_operand.vmem [shape: bf16[64,32], index: 14, kind: input, shape index: {}]   ;;  %s2767_s15 = inlined_call_operand.vmem [shape: f32[1,32], index: 15, kind: input, shape index: {}]   ;;  %s2768_s16 = inlined_call_operand.hbm [shape: f32[2,8,32], index: 16, kind: output, shape index: {}]  }
   0x1   :  { %2777 = sst [smem:[#allocation16_spill]] %s2752_s0 }
   0x2   :  { %2778 = sst [smem:[#allocation17_spill]] %s2757_s5 }
   0x3   :  { %2779 = sst [smem:[#allocation18_spill]] %s2759_s7 }
   0x4   :  { %2780 = sst [smem:[#allocation19_spill]] %s2760_s8 }
   0x5   :  { %2781 = sst [smem:[#allocation20_spill]] %s2762_s10 }
   0x6   :  { %2782 = sst [smem:[#allocation21_spill]] %s2763_s11 }
   0x7   :  { %2783 = sst [smem:[#allocation22_spill]] %s2764_s12 }
   0x8   :  { %2784 = sst [smem:[#allocation23_spill]] %s2765_s13 }
   0x9   :  { %2785 = sst [smem:[#allocation24_spill]] %s2766_s14 }
   0xa   :  { %2786 = sst [smem:[#allocation25_spill]] %s2767_s15 }
   0xb   :  { %2787 = sst [smem:[#allocation26_spill]] %s2768_s16 }
   0xc   :  { %21 = vsyncpa [#allocation3], 0 }
   0xd   :  { %23 = vsyncpa [#allocation3 + $0x1], 0 }
   0xe   :  { %24 = vsyncpa [#allocation6], 0 }
   0xf   :  { %25 = vsyncpa [#allocation9], 0 }
  0x10   :  { %26 = vsyncpa [#allocation4], 0 }
  0x11   :  { %28 = vsyncpa [#allocation4 + $0x1], 0  ;;  %s2312_s21 = smov 0   ;;  %s2314_s22 = smov 0  }
  0x12   :  { %s2316_s23 = smov 0   ;;  %s2318_s24 = smov 0  }
  0x13   :  { %s2320_s25 = smov 0   ;;  %s2322_s26 = smov 0  }
  0x14 LB: > { %s2769_s27 = sadd.s32 4294967295, %s2205_s26   ;;  %p1645_p0 = scmp.ge.s32.totalorder %s2205_s26, 1  ;;  %s2205_s26 = sphi %s2322_s26, %s34_s26   ;;  %s2201_s25 = sphi %s2320_s25, %s2819_s25   ;;  %s2197_s24 = sphi %s2318_s24, %s2818_s24   ;;  %s2193_s23 = sphi %s2316_s23, %s2817_s23   ;;  %s2189_s22 = sphi %s2314_s22, %s2816_s22   ;;  %s2185_s21 = sphi %s2312_s21, %s2815_s21  }
  0x15   : > { %p2346_p1 = scmp.eq.s32.totalorder %s2769_s27, 0  ;;  %p427_p2 = scmp.lt.s32.totalorder %s2205_s26, 3 }
  0x16   : > { %s2207_s30 = smov [#allocation5]   ;;  %s2208_s17 = smov [#allocation8]  }
  0x17   : > { %s2788_s28 = scalar_select %p2346_p1, 1, 0 }
  0x18   : > { %p2351_p3 = pnand %p1645_p0, %p427_p2  ;;  %s449_s0 = sshll.u32 %s2207_s30, 4  ;;  %s450_s0 = int_to_ptr.vmem [resolvable:$true] %s449_s0 }
  0x19   : > { %s473_s18 = sshll.u32 %s2208_s17, 4  ;;  %s2209_s20 = smov [#allocation7]   ;;  %s2364_s18 = int_to_ptr.vmem [resolvable:$true] %s473_s18 }
  0x1a   : > { %s2789_s29 = scalar_select %p2351_p3, 1, 0 }
  0x1b   : > { %p1844_p5 = pneg %p2351_p3  ;;  %s2366_s27 = sshll.u32 %s2209_s20, 4  ;;  %s464_s27 = int_to_ptr.vmem [resolvable:$true] %s2366_s27 }
  0x1c   : > { %s2791_s5 = sld [smem:[#allocation17_spill]] }
  0x1d   : > { %p2360_p6 = pnand %p1844_p5, %p2346_p1 }
  0x1f   : > { %p2376_p8 = pneg %p2360_p6 }
  0x22   : > { %s1973_s30 = scalar_lea.hbm %s2791_s5, 16 }
  0x23   : > { %p1974_p7 = scmp.ne.s32.totalorder %s2791_s5, %s1973_s30  ;;  %p1980_p11 = scmp.lt.u32.totalorder %s1973_s30, %s2791_s5 }
  0x25   : > { %p1976_p9 = pnand %p2376_p8, %p1974_p7 }
  0x27   : > { %p1977_p10 = pneg %p1976_p9 }
  0x29   : > { %p1982_p12 = pnand %p1980_p11, %p1977_p10 }
  0x2b   : > { %1985 = shalt.err (!%p1982_p12)
}
  0x2c   : > { %s1986_s15 = scalar_lea.vmem %s450_s0, 16  ;;  %s1993_s11 = scalar_lea.vmem %s450_s0, 32 }
  0x2d   : > { %p1987_p13 = scmp.ne.s32.totalorder %s450_s0, %s1986_s15  ;;  %p1994_p5 = scmp.lt.s32.totalorder %s450_s0, %s450_s0 }
  0x2e   : > { %p1995_p4 = scmp.lt.s32.totalorder %s1993_s11, %s1986_s15 }
  0x2f   : > { %p1989_p0 = pnand %p1987_p13, %p2376_p8 }
  0x30   : > { %p1996_p3 = por %p1995_p4, %p1994_p5 }
  0x31   : > { %p1990_p2 = pneg %p1989_p0 }
  0x33   : > { %p1997_p1 = pnand %p1996_p3, %p1990_p2 }
  0x35   : > { %2000 = shalt.err (!%p1997_p1)
}
  0x36   : > { %1847 = dma.hbm_to_vmem [thread:$0]  (!%p2360_p6), %s2791_s5, 16, %s450_s0, [#allocation6]  }
  0x37   : > { %s2793_s8 = sld [smem:[#allocation19_spill]] }
  0x3d   : > { %s2001_s20 = scalar_lea.hbm %s2793_s8, 256 }
  0x3e   : > { %p2002_p7 = scmp.ne.s32.totalorder %s2793_s8, %s2001_s20  ;;  %p2008_p1 = scmp.lt.u32.totalorder %s2001_s20, %s2793_s8 }
  0x40   : > { %p2004_p9 = pnand %p2002_p7, %p2376_p8 }
  0x42   : > { %p2005_p4 = pneg %p2004_p9 }
  0x44   : > { %p2010_p3 = pnand %p2008_p1, %p2005_p4 }
  0x46   : > { %2013 = shalt.err (!%p2010_p3)
}
  0x47   : > { %s2014_s0 = scalar_lea.vmem %s2364_s18, 256  ;;  %p2022_p13 = scmp.lt.s32.totalorder %s2364_s18, %s2364_s18 }
  0x48   : > { %p2015_p10 = scmp.ne.s32.totalorder %s2364_s18, %s2014_s0  ;;  %p2023_p0 = scmp.lt.s32.totalorder %s2014_s0, %s2014_s0 }
  0x4a   : > { %p2017_p11 = pnand %p2015_p10, %p2376_p8  ;;  %p2024_p2 = por %p2023_p0, %p2022_p13 }
  0x4c   : > { %p2018_p12 = pneg %p2017_p11 }
  0x4e   : > { %p2025_p5 = pnand %p2024_p2, %p2018_p12 }
  0x50   : > { %2028 = shalt.err (!%p2025_p5)
}
  0x51   : > { %s2210_s12 = smov 64   ;;  %s2211_s14 = smov 4  }
  0x52   : > { %1853 = dma.hbm_to_vmem [thread:$0]  (!%p2360_p6), %s2793_s8, 256, %s2364_s18, [#allocation9], %s2210_s12, %s2210_s12, %s2211_s14  }
  0x53   : > { %s2794_s7 = sld [smem:[#allocation18_spill]] }
  0x59   : > { %s2029_s20 = scalar_lea.hbm %s2794_s7, 16 }
  0x5a   : > { %p2030_p7 = scmp.ne.s32.totalorder %s2794_s7, %s2029_s20  ;;  %p2036_p1 = scmp.lt.u32.totalorder %s2029_s20, %s2794_s7 }
  0x5c   : > { %p2032_p9 = pnand %p2030_p7, %p2376_p8 }
  0x5e   : > { %p2033_p4 = pneg %p2032_p9 }
  0x60   : > { %p2038_p3 = pnand %p2036_p1, %p2033_p4 }
  0x62   : > { %2041 = shalt.err (!%p2038_p3)
}
  0x63   : > { %s2042_s13 = scalar_lea.vmem %s464_s27, 16  ;;  %s2049_s18 = scalar_lea.vmem %s464_s27, 32 }
  0x64   : > { %p2043_p10 = scmp.ne.s32.totalorder %s464_s27, %s2042_s13  ;;  %p2050_p13 = scmp.lt.s32.totalorder %s464_s27, %s464_s27 }
  0x65   : > { %p2051_p0 = scmp.lt.s32.totalorder %s2049_s18, %s2042_s13 }
  0x66   : > { %p2045_p11 = pnand %p2043_p10, %p2376_p8 }
  0x67   : > { %p2052_p2 = por %p2051_p0, %p2050_p13 }
  0x68   : > { %p2046_p12 = pneg %p2045_p11 }
  0x6a   : > { %p2053_p5 = pnand %p2052_p2, %p2046_p12 }
  0x6c   : > { %2056 = shalt.err (!%p2053_p5)
}
  0x6d   : > { %1850 = dma.hbm_to_vmem [thread:$0]  (!%p2360_p6), %s2794_s7, 16, %s464_s27, [#allocation6]  }
  0x6e   : > { %s2212_s5 = smov [#allocation10]   ;;  %s2057_s20 = scalar_lea.hbm %s2761_s9, 16 }
  0x6f   : > { %s487_s16 = sshll.u32 %s2212_s5, 4  ;;  %p2058_p7 = scmp.ne.s32.totalorder %s2761_s9, %s2057_s20  ;;  %s488_s16 = int_to_ptr.vmem [resolvable:$true] %s487_s16 }
  0x70   : > { %p2064_p1 = scmp.lt.u32.totalorder %s2057_s20, %s2761_s9 }
  0x71   : > { %p2060_p9 = pnand %p2058_p7, %p2376_p8 }
  0x73   : > { %p2061_p4 = pneg %p2060_p9 }
  0x75   : > { %p2066_p3 = pnand %p2064_p1, %p2061_p4 }
  0x77   : > { %2069 = shalt.err (!%p2066_p3)
}
  0x78   : > { %s2070_s27 = scalar_lea.vmem %s488_s16, 16  ;;  %s2077_s18 = scalar_lea.vmem %s488_s16, 32 }
  0x79   : > { %p2071_p10 = scmp.ne.s32.totalorder %s488_s16, %s2070_s27  ;;  %p2078_p13 = scmp.lt.s32.totalorder %s488_s16, %s488_s16 }
  0x7a   : > { %p2079_p0 = scmp.lt.s32.totalorder %s2077_s18, %s2070_s27 }
  0x7b   : > { %p2073_p11 = pnand %p2071_p10, %p2376_p8 }
  0x7c   : > { %p2080_p2 = por %p2079_p0, %p2078_p13 }
  0x7d   : > { %p2074_p12 = pneg %p2073_p11 }
  0x7f   : > { %p2081_p5 = pnand %p2080_p2, %p2074_p12 }
  0x81   : > { %2084 = shalt.err (!%p2081_p5)
}
  0x82   : > { %1856 = dma.hbm_to_vmem [thread:$0]  (!%p2360_p6), %s2761_s9, 16, %s488_s16, [#allocation9]  }
  0x83   : > { %s1644_s17 = sadd.s32 4294967294, %s2205_s26   ;;  %s46_s5 = sadd.s32 1, %s2201_s25 }
  0x84   : > { %p48_p8 = scmp.ge.s32.totalorder %s46_s5, 2  ;;  %s81_s19 = sadd.s32 1, %s2193_s23 }
  0x85   : > { %p88_p7 = scmp.ne.s32.totalorder %s2193_s23, %s2189_s22  ;;  %p89_p9 = scmp.eq.s32.totalorder %s2205_s26, 0 }
  0x86   : > { %s2821_s5 = smov (%p48_p8, %s46_s5), 0  ;;  %p94_p1 = scmp.ne.s32.totalorder %s2189_s22, %s2185_s21 }
  0x87   : > { %p2460_p4 = por %p89_p9, %p88_p7  ;;  %s76_s16 = ssub.s32 %s2201_s25, %s2821_s5 }
  0x88   : > { %s2796_s30 = sadd.s32 4294967295, %s2205_s26   ;;  %p79_p3 = scmp.eq.s32.totalorder %s76_s16, 0 }
  0x89   : > { %p414_p6 = scmp.eq.s32.totalorder %s2796_s30, 1  ;;  %p2797_p10 = scmp.ne.s32.totalorder %s2788_s28, 0 }
  0x8a   : > { %p420_p13 = scmp.eq.s32.totalorder %s1644_s17, 1  ;;  %p1869_p2 = scmp.lt.s32.totalorder %s2205_s26, 2 }
  0x8b   : > { %p2472_p11 = por %p2797_p10, %p94_p1  ;;  %p2476_p12 = por %p414_p6, %p88_p7 }
  0x8c   : > { %s2481_s11 = scalar_select %p79_p3, %s2193_s23, %s81_s19  }
  0x8d   : > { %s2799_s15 = scalar_select %p2476_p12, 1, 0 }
  0x8e   : > { %p2483_p0 = por %p420_p13, %p94_p1  ;;  %s523_s13 = sand.u32 1, %s2193_s23  }
  0x8f   : > { %s1652_s27 = sshll.u32 %s2201_s25, 6  ;;  %s1651_s18 = sshll.u32 %s523_s13, 2 }
  0x90   : > { %s2800_s0 = scalar_select %p2483_p0, 1, 0 }
  0x91   : > { %s2493_s16 = scalar_lea.hbm %s2753_s1, %s1652_s27  ;;  %s527_s17 = scalar_lea.vmem [#allocation2], %s1651_s18 }
  0x92   : > { %s535_s19 = sshll.u32 %s527_s17, 4  ;;  %p2497_p5 = pnand %p1869_p2, %p2460_p4  ;;  %s2501_s19 = int_to_ptr.vmem [resolvable:$true] %s535_s19 }
  0x93   : > { %s524_s7 = scalar_lea.sflag [#allocation3], %s523_s13  ;;  %s2085_s8 = scalar_lea.hbm %s2493_s16, 64 }
  0x94   : > { %p2086_p8 = scmp.ne.s32.totalorder %s2493_s16, %s2085_s8  ;;  %p2087_p7 = pneg %p2497_p5 }
  0x95   : > { %s2090_s10 = scalar_lea.hbm %s2753_s1, 128  ;;  %p2091_p4 = scmp.lt.u32.totalorder %s2493_s16, %s2753_s1 }
  0x96   : > { %p2088_p9 = pnand %p2087_p7, %p2086_p8  ;;  %p2092_p6 = scmp.lt.u32.totalorder %s2090_s10, %s2085_s8 }
  0x97   : > { %p2094_p10 = scmp.lt.u32.totalorder %s2085_s8, %s2493_s16 }
  0x98   : > { %p2089_p1 = pneg %p2088_p9  ;;  %p2093_p3 = por %p2092_p6, %p2091_p4 }
  0x9a   : > { %p2095_p13 = por %p2094_p10, %p2093_p3 }
  0x9c   : > { %p2096_p2 = pnand %p2095_p13, %p2089_p1 }
  0x9e   : > { %2099 = shalt.err (!%p2096_p2)
}
  0x9f   : > { %s2100_s13 = scalar_lea.vmem %s2501_s19, 64  ;;  %s2213_s17 = smov [#allocation2]  }
  0xa0   : > { %p2101_p8 = scmp.ne.s32.totalorder %s2501_s19, %s2100_s13  ;;  %s2105_s27 = sshll.u32 %s2213_s17, 4  ;;  %s2106_s27 = int_to_ptr.vmem [resolvable:$false] %s2105_s27 }
  0xa1   : > { %s2107_s18 = scalar_lea.vmem %s2106_s27, 128  ;;  %p2108_p12 = scmp.lt.s32.totalorder %s2501_s19, %s2106_s27 }
  0xa2   : > { %p2103_p9 = pnand %p2101_p8, %p2087_p7  ;;  %p2109_p4 = scmp.lt.s32.totalorder %s2107_s18, %s2100_s13 }
  0xa4   : > { %p2104_p0 = pneg %p2103_p9  ;;  %p2110_p6 = por %p2109_p4, %p2108_p12 }
  0xa6   : > { %p2111_p3 = pnand %p2110_p6, %p2104_p0 }
  0xa8   : > { %2114 = shalt.err (!%p2111_p3)
}
  0xa9   : > { %1860 = dma.hbm_to_vmem [thread:$0]  (!%p2497_p5), %s2493_s16, 64, %s2501_s19, %s524_s7  }
  0xaa   : > { %p2802_p1 = scmp.ne.s32.totalorder %s2789_s29, 0 }
  0xab   : > { %s2531_s8 = sand.u32 (!%p2802_p1), 1, %s2189_s22  }
  0xac   : > { %544 = sbr.rel (%p2802_p1) target bundleno = 2748 (0xabc), region = 84  ;;  %s1654_s10 = sshll.u32 (!%p2802_p1), %s2531_s8, 2 }
  0xad   : > { %s547_s12 = scalar_lea.sflag (!%p2802_p1), [#allocation3], %s2531_s8  ;;  %s2535_s14 = scalar_lea.vmem (!%p2802_p1), [#allocation2], %s1654_s10 }
  0xb3   : > { %2168 = dma.done.wait (%p2472_p11), %s547_s12, 64  }
  0xb4   : > { %2170 = vsyncadd (%p2472_p11), %s547_s12, 4294967232  ;;  %p2803_p12 = scmp.ne.s32.totalorder %s2788_s28, 0 }
  0xb6   : > { %2172 = dma.done.wait (%p2803_p12), [#allocation6], 32  }
  0xb7   : > { %2174 = vsyncadd (%p2803_p12), [#allocation6], 4294967264 }
  0xb8   : > { %2176 = dma.done.wait (%p2803_p12), [#allocation9], 272  }
  0xb9   : > { %2178 = vsyncadd (%p2803_p12), [#allocation9], 4294967024  ;;  %p619_p0 = scmp.lt.s32.totalorder %s2197_s24, 1  ;;  %s2804_s19 = sld [smem:[#allocation16_spill]]  ;;  %vm625_vm0 = vcmask 261120   ;;  %v1941_v7 = vld [vmem:[%s2756_s4] sm:$0xff]  }
  0xba   : > { %v2214_v8 = vmov 0.0   ;;  %vm2215_vm1 = vmmov 0   ;;  %v1942_v9 = vld [vmem:[%s2756_s4 + $0x8] sm:$0xff]   ;;  %v1661_v14 = vld [vmem:[%s2754_s2] ss:$0 sm:$0xff]  ;;  %vm790_vm2 = vcmask 64512  }
  0xbb   : > { %s620_s7 = scalar_select %p619_p0, %s2197_s24, 1  ;;  %1732 = vmatprep.subr.bf16.mxu1 %v2214_v8  ;;  %1736 = vmatprep.mubr.msk.bf16.mxu1 %vm2215_vm1, %v2214_v8  ;;  %v1662_v16 = vld [vmem:[%s2755_s3] ss:$0 sm:$0xff]  ;;  %v1944_v21 = vld [vmem:[%s2758_s6 + $0x8] sm:$0xff]   ;;  %vm855_vm3 = vcmask 1043456   ;;  %vm1243_vm4 = vcmask 130048  }
  0xbc   : > { %1733 = vmatpush3.bf16.msra.mxu1 %v1941_v7  ;;  %1748 = vmatprep.subr.bf16.mxu0 %v2214_v8  ;;  %v1943_v19 = vld [vmem:[%s2758_s6] sm:$0xff]   ;;  %v1667_v26 = vld [vmem:[#allocation7] ss:$0 sm:$0xff]  ;;  %v1663_v27 = vld [vmem:[#allocation5] ss:$0 sm:$0xff]  ;;  %s2217_s28 = smov 120  }
  0xbd   : > { %s1660_s29 = sshll.u32 %s620_s7, 3  ;;  %1734 = vmatprep.subr.bf16.mxu1 %v2214_v8  ;;  %1750 = vmatprep.mubr.msk.bf16.mxu0 %vm2215_vm1, %v2214_v8  ;;  %s2218_s13 = smov 104   ;;  %v788_v46 = vld [vmem:[%s2535_s14] sm:$0xf]  ;;  %vm1245_vm5 = vcmask 195584   ;;  %vm1452_vm6 = vcmask 523264  }
  0xbe   : > { %v789_v47 = vunpack.c.l.bf16 %v788_v46  ;;  %s2219_s14 = smov 88   ;;  %s2220_s17 = smov 96  }
  0xbf   : > { %s622_s30 = scalar_lea.vmem %s2804_s19, %s1660_s29  ;;  %s2221_s27 = smov 72  }
  0xc0   : > { %v2554_v0 = vld [vmem:[%s622_s30] sm:$0xff]  ;;  %1735 = vmatpush3.bf16.msra.mxu1 %v1942_v9  ;;  %s2216_s30 = smov 112   ;;  %s2222_s18 = smov 80  }
  0xc1   : > { %v626_v1 = vsel %vm625_vm0, %v2554_v0, 0.0  ;;  %1740 = vmatprep.subr.bf16.mxu1 %v2214_v8  ;;  %s2223_s10 = smov 8   ;;  %s2224_s12 = smov 16  }
  0xc2   : > { %627 = vadd.xlane.f32.xlu0 %v626_v1  ;;  %s2225_s7 = smov 24   ;;  %s2805_s20 = sld [smem:[#allocation22_spill]] }
  0xc3   : > { %s2808_s16 = sld [smem:[#allocation21_spill]]  ;;  %s2810_s29 = sld [smem:[#allocation25_spill]] }
  0xc4   : > { %p2812_p5 = scmp.ne.s32.totalorder %s2799_s15, 0 }
 0x14f   : > { %v628_v2 = vpop.xlane.xlu0 %627 }
 0x150   : > { %v630_v3 = vmul.f32 0.03125, %v628_v2 }
 0x152   : > { %v631_v4 = vsub.f32 %v2554_v0, %v630_v3 }
 0x154   : > { %v632_v5 = vmul.f32 %v631_v4, %v631_v4 }
 0x156   : > { %v633_v6 = vsel %vm625_vm0, %v632_v5, 0.0 }
 0x157   : > { %634 = vadd.xlane.f32.xlu0 %v633_v6 }
 0x1e4   : > { %v635_v10 = vpop.xlane.xlu0 %634 }
 0x1e5   : > { %v636_v11 = vmul.f32 0.03125, %v635_v10 }
 0x1e7   : > { %v637_v12 = vadd.f32 1e-05, %v636_v11 }
 0x1e9   : > { %1953 = vrsqrt.f32 %v637_v12 }
 0x1f3   : > { %v1954_v13 = vpop.eup %1953 }
 0x1f4   : > { %v639_v15 = vmul.f32 %v1954_v13, %v631_v4 }
 0x1f6   : > { %v647_v17 = vmul.f32 %v1661_v14, %v639_v15 }
 0x1f8   : > { %v655_v18 = vadd.f32 %v1662_v16, %v647_v17 }
 0x1fa   : > { %v656_v20 = vpack.c.bf16 %v655_v18, %v655_v18 }
 0x1fc   : > { %1737 = vmatmul.mubr.msk.bf16.vlgmr.msra.gmra.mrb[0].mxu1 %vm625_vm0, %v656_v20 }
 0x1fd   : > { %1741 = vmatpush3.bf16.msra.mxu1 %v1943_v19  ;;  %1744 = vmatprep.mubr.msk.bf16.mxu1 %vm2215_vm1, %v2214_v8 }
 0x1fe   : > { %1742 = vmatprep.subr.bf16.mxu1 %v2214_v8 }
 0x201   : > { %1743 = vmatpush3.bf16.msra.mxu1 %v1944_v21 }
 0x202   : > { %1754 = vmatprep.subr.bf16.mxu1 %v2214_v8 }
 0x204   : > { %1745 = vmatmul.mubr.msk.bf16.vlgmr.msra.gmra.mrb[4].mxu1 %vm625_vm0, %v656_v20 }
 0x205   : > { %1756 = vmatprep.mubr.msk.bf16.mxu1 %vm2215_vm1, %v2214_v8 }
 0x2cf   : > { %v717_v22 = vpop.f32.mrb[0].mxu1 }
 0x2d0   : > { %v1738_v23 = vpop.f32.mrb[1].mxu1  ;;  %v718_v32 = vadd.f32 %v1663_v27, %v717_v22 }
 0x2d1   : > { %v720_v24 = vpop.f32.mrb[2].mxu1 }
 0x2d2   : > { %v1739_v25 = vpop.f32.mrb[3].mxu1  ;;  %v786_v36 = vpack.c.bf16 %v718_v32, %v718_v32 }
 0x2d7   : > { %v780_v28 = vpop.f32.mrb[4].mxu1 }
 0x2d8   : > { %v781_v29 = vadd.f32 %v1667_v26, %v780_v28  ;;  %v1746_v30 = vpop.f32.mrb[5].mxu1 }
 0x2d9   : > { %v783_v31 = vpop.f32.mrb[6].mxu1 }
 0x2da   : > { %v2594_v33 = vpack.c.bf16 %v781_v29, %v781_v29  ;;  %v1747_v34 = vpop.f32.mrb[7].mxu1 }
 0x2dc   : > { %1012 = vrot.lane.b32.xlu0 %v2594_v33, %s2216_s30  ;;  %902 = vrot.lane.b32.xlu1 %v2594_v33, %s2217_s28  ;;  %v795_v35 = vsel %vm790_vm2, %v2594_v33, 0 }
 0x2dd   : > { %1749 = vmatpush3.bf16.xpose.msra.mxu0 %v795_v35 }
 0x2de   : > { %1760 = vmatprep.subr.bf16.mxu0 %v2214_v8 }
 0x2e0   : > { %900 = vrot.lane.b32.xlu1 %v786_v36, %s2217_s28 }
 0x2e4   : > { %1010 = vrot.lane.b32.xlu1 %v786_v36, %s2216_s30  ;;  %1751 = vmatmul.mubr.msk.bf16.vlgmr.msra.gmra.mrb[0].mxu0 %vm790_vm2, %v786_v36 }
 0x2e5   : > { %1762 = vmatprep.mubr.msk.bf16.mxu0 %vm2215_vm1, %v2214_v8 }
 0x2e8   : > { %1122 = vrot.lane.b32.xlu1 %v2594_v33, %s2218_s13 }
 0x2ec   : > { %1120 = vrot.lane.b32.xlu1 %v786_v36, %s2218_s13 }
 0x34e   : > { %v903_v37 = vpop.permute.xlu1 %902  ;;  %v1013_v40 = vpop.permute.xlu0 %1012 }
 0x34f   : > { %v908_v38 = vsel %vm790_vm2, %v903_v37, 0  ;;  %v1018_v42 = vsel %vm790_vm2, %v1013_v40, 0 }
 0x350   : > { %1761 = vmatpush3.bf16.xpose.msra.mxu0 %v908_v38 }
 0x351   : > { %1772 = vmatprep.subr.bf16.mxu0 %v2214_v8 }
 0x352   : > { %v901_v39 = vpop.permute.xlu1 %900 }
 0x356   : > { %v1011_v41 = vpop.permute.xlu1 %1010 }
 0x357   : > { %1763 = vmatmul.mubr.msk.bf16.vlgmr.msra.gmra.mrb[4].mxu0 %vm790_vm2, %v901_v39 }
 0x358   : > { %1773 = vmatpush3.bf16.xpose.msra.mxu0 %v1018_v42  ;;  %1774 = vmatprep.mubr.msk.bf16.mxu0 %vm2215_vm1, %v2214_v8 }
 0x359   : > { %1784 = vmatprep.subr.bf16.mxu0 %v2214_v8 }
 0x35a   : > { %v1123_v43 = vpop.permute.xlu1 %1122 }
 0x35b   : > { %v1128_v44 = vsel %vm790_vm2, %v1123_v43, 0 }
 0x35e   : > { %v1121_v45 = vpop.permute.xlu1 %1120 }
 0x35f   : > { %1775 = vmatmul.mubr.msk.bf16.vlgmr.msra.gmra.mrb[8].mxu0 %vm790_vm2, %v1011_v41 }
 0x360   : > { %1785 = vmatpush3.bf16.xpose.msra.mxu0 %v1128_v44  ;;  %1786 = vmatprep.mubr.msk.bf16.mxu0 %vm2215_vm1, %v2214_v8 }
 0x361   : > { %1796 = vmatprep.subr.bf16.mxu0 %v2214_v8 }
 0x367   : > { %1787 = vmatmul.mubr.msk.bf16.vlgmr.msra.gmra.mrb[12].mxu0 %vm790_vm2, %v1121_v45 }
 0x368   : > { %1800 = vmatprep.mubr.msk.bf16.mxu0 %vm2215_vm1, %v2214_v8 }
 0x3b7   : > { %v831_v48 = vpop.f32.mrb[0].mxu0 }
 0x3b8   : > { %v832_v49 = vadd.f32 %v831_v48, %v789_v47  ;;  %v1752_v50 = vpop.f32.mrb[1].mxu0 }
 0x3b9   : > { %v834_v51 = vpop.f32.mrb[2].mxu0 }
 0x3ba   : > { %v1753_v52 = vpop.f32.mrb[3].mxu0  ;;  %v837_v53 = vsel %vm790_vm2, %v832_v49, -inf }
 0x3bb   : > { %838 = vmax.xlane.f32.xlu1 %v837_v53 }
 0x42a   : > { %v944_v54 = vpop.f32.mrb[4].mxu0 }
 0x42b   : > { %v945_v55 = vadd.f32 %v944_v54, %v789_v47  ;;  %v1764_v56 = vpop.f32.mrb[5].mxu0 }
 0x42c   : > { %v947_v57 = vpop.f32.mrb[6].mxu0 }
 0x42d   : > { %v1765_v58 = vpop.f32.mrb[7].mxu0  ;;  %v950_v59 = vsel %vm790_vm2, %v945_v55, -inf }
 0x42e   : > { %951 = vmax.xlane.f32.xlu0 %v950_v59 }
 0x432   : > { %v1054_v60 = vpop.f32.mrb[8].mxu0 }
 0x433   : > { %v1055_v61 = vadd.f32 %v1054_v60, %v789_v47  ;;  %v1776_v62 = vpop.f32.mrb[9].mxu0 }
 0x434   : > { %v1057_v63 = vpop.f32.mrb[10].mxu0  ;;  %v1945_v62 = vld [vmem:[#allocation8] sm:$0xff]  }
 0x435   : > { %v1777_v1 = vpop.f32.mrb[11].mxu0  ;;  %v1060_v2 = vsel %vm790_vm2, %v1055_v61, -inf  ;;  %1797 = vmatpush3.bf16.msra.mxu0 %v1945_v62  ;;  %v1946_v63 = vld [vmem:[#allocation8 + $0x8] sm:$0xff]  }
 0x436   : > { %1061 = vmax.xlane.f32.xlu1 %v1060_v2  ;;  %1798 = vmatprep.subr.bf16.mxu0 %v2214_v8 }
 0x439   : > { %1799 = vmatpush3.bf16.msra.mxu0 %v1946_v63 }
 0x43a   : > { %v1164_v3 = vpop.f32.mrb[12].mxu0  ;;  %1812 = vmatprep.subr.bf16.mxu0 %v2214_v8 }
 0x43b   : > { %v1165_v4 = vadd.f32 %v1164_v3, %v789_v47  ;;  %v1788_v5 = vpop.f32.mrb[13].mxu0 }
 0x43c   : > { %v1167_v6 = vpop.f32.mrb[14].mxu0 }
 0x43d   : > { %v1789_v7 = vpop.f32.mrb[15].mxu0  ;;  %v1170_v9 = vsel %vm790_vm2, %v1165_v4, -inf }
 0x43e   : > { %1171 = vmax.xlane.f32.xlu1 %v1170_v9 }
 0x448   : > { %v839_v10 = vpop.xlane.xlu1 %838 }
 0x449   : > { %v840_v11 = vsub.f32 %v832_v49, %v839_v10 }
 0x44b   : > { %v841_v12 = vmul.f32 1.442695, %v840_v11 }
 0x44d   : > { %1955 = vpow2.f32 %v841_v12 }
 0x457   : > { %v1956_v13 = vpop.eup %1955 }
 0x458   : > { %v843_v14 = vsel %vm790_vm2, %v1956_v13, 0.0 }
 0x459   : > { %844 = vadd.xlane.f32.xlu0 %v843_v14 }
 0x4bb   : > { %v952_v15 = vpop.xlane.xlu0 %951 }
 0x4bc   : > { %v953_v16 = vsub.f32 %v945_v55, %v952_v15 }
 0x4be   : > { %v954_v17 = vmul.f32 1.442695, %v953_v16 }
 0x4c0   : > { %1957 = vpow2.f32 %v954_v17  ;;  %v1679_v17 = vld [vmem:[#allocation10] ss:$0 sm:$0xff] }
 0x4c3   : > { %v1062_v18 = vpop.xlane.xlu1 %1061 }
 0x4c4   : > { %v1063_v19 = vsub.f32 %v1055_v61, %v1062_v18 }
 0x4c6   : > { %v1064_v20 = vmul.f32 1.442695, %v1063_v19 }
 0x4c8   : > { %1959 = vpow2.f32 %v1064_v20 }
 0x4ca   : > { %v1958_v21 = vpop.eup %1957 }
 0x4cb   : > { %v956_v22 = vsel %vm790_vm2, %v1958_v21, 0.0  ;;  %v1172_v25 = vpop.xlane.xlu1 %1171 }
 0x4cc   : > { %957 = vadd.xlane.f32.xlu1 %v956_v22  ;;  %v1173_v26 = vsub.f32 %v1165_v4, %v1172_v25 }
 0x4ce   : > { %v1174_v27 = vmul.f32 1.442695, %v1173_v26 }
 0x4d0   : > { %1961 = vpow2.f32 %v1174_v27 }
 0x4d2   : > { %v1960_v23 = vpop.eup %1959 }
 0x4d3   : > { %v1066_v24 = vsel %vm790_vm2, %v1960_v23, 0.0 }
 0x4d4   : > { %1067 = vadd.xlane.f32.xlu0 %v1066_v24 }
 0x4da   : > { %v1962_v28 = vpop.eup %1961 }
 0x4db   : > { %v1176_v29 = vsel %vm790_vm2, %v1962_v28, 0.0 }
 0x4dd   : > { %962 = vrot.lane.b32.xlu1 %v2594_v33, %s2219_s14  ;;  %s2806_s14 = sld [smem:[#allocation24_spill]] }
 0x4e6   : > { %v845_v30 = vpop.xlane.xlu0 %844 }
 0x4e7   : > { %1963 = vrcp.f32 %v845_v30  ;;  %v1947_v30 = vld [vmem:[%s2805_s20] sm:$0xff]  }
 0x4ea   : > { %850 = vrot.lane.b32.xlu0 %v2594_v33, %s2220_s17  ;;  %s2811_s17 = sld [smem:[#allocation26_spill]] }
 0x4ee   : > { %1182 = vrot.lane.b32.xlu0 %v2594_v33, %s2221_s27 }
 0x4f1   : > { %v1964_v32 = vpop.eup %1963 }
 0x4f2   : > { %v847_v35 = vmul.f32 %v1964_v32, %v1956_v13  ;;  %v1950_v32 = vld [vmem:[%s2806_s14 + $0x8] sm:$0xff]  }
 0x4f4   : > { %v848_v39 = vpack.c.bf16 %v847_v35, %v847_v35 }
 0x501   : > { %1177 = vadd.xlane.f32.xlu1 %v1176_v29 }
 0x512   : > { %1072 = vrot.lane.b32.xlu1 %v2594_v33, %s2222_s18  ;;  %s2809_s18 = sld [smem:[#allocation23_spill]] }
 0x559   : > { %v958_v31 = vpop.xlane.xlu1 %957 }
 0x55a   : > { %1965 = vrcp.f32 %v958_v31  ;;  %v1949_v31 = vld [vmem:[%s2806_s14] sm:$0xff]  }
 0x55d   : > { %v963_v38 = vpop.permute.xlu1 %962 }
 0x55e   : > { %v968_v41 = vsel %vm855_vm3, %v963_v38, 0 }
 0x561   : > { %v1068_v34 = vpop.xlane.xlu0 %1067 }
 0x562   : > { %1967 = vrcp.f32 %v1068_v34 }
 0x564   : > { %v1966_v40 = vpop.eup %1965 }
 0x565   : > { %v851_v36 = vpop.permute.xlu0 %850  ;;  %v960_v33 = vmul.f32 %v1966_v40, %v1958_v21  ;;  %v1684_v40 = vld [vmem:[%s2808_s16] ss:$0 sm:$0xff]  ;;  %s1696_s16 = sshll.u32 %s2197_s24, 7  ;;  %s1499_s24 = scalar_lea.sflag [#allocation4], %s2531_s8 }
 0x566   : > { %v857_v37 = vsel %vm855_vm3, %v851_v36, 0  ;;  %s2702_s27 = scalar_lea.hbm %s2811_s17, %s1696_s16 }
 0x567   : > { %1755 = vmatpush3.bf16.msra.mxu1 %v857_v37  ;;  %v961_v42 = vpack.c.bf16 %v960_v33, %v960_v33 }
 0x568   : > { %1766 = vmatprep.subr.bf16.mxu1 %v2214_v8 }
 0x569   : > { %v1183_v48 = vpop.permute.xlu0 %1182 }
 0x56a   : > { %1757 = vmatmul.mubr.msk.bf16.vlgmr.msra.gmra.mrb[8].mxu1 %vm790_vm2, %v848_v39  ;;  %v1188_v50 = vsel %vm855_vm3, %v1183_v48, 0 }
 0x56b   : > { %1767 = vmatpush3.bf16.msra.mxu1 %v968_v41  ;;  %1768 = vmatprep.mubr.msk.bf16.mxu1 %vm2215_vm1, %v2214_v8 }
 0x56c   : > { %1778 = vmatprep.subr.bf16.mxu1 %v2214_v8  ;;  %v1968_v43 = vpop.eup %1967 }
 0x56d   : > { %v1070_v45 = vmul.f32 %v1968_v43, %v1960_v23  ;;  %v1951_v43 = vld [vmem:[%s2806_s14 + $0x10] sm:$0xff]  }
 0x56f   : > { %v1071_v49 = vpack.c.bf16 %v1070_v45, %v1070_v45  ;;  %v1685_v45 = vld [vmem:[%s2809_s18] ss:$0 sm:$0xff] }
 0x572   : > { %1769 = vmatmul.mubr.msk.bf16.vlgmr.msra.gmra.mrb[12].mxu1 %vm790_vm2, %v961_v42 }
 0x573   : > { %1780 = vmatprep.mubr.msk.bf16.mxu1 %vm2215_vm1, %v2214_v8 }
 0x58e   : > { %v1178_v44 = vpop.xlane.xlu1 %1177 }
 0x58f   : > { %1969 = vrcp.f32 %v1178_v44  ;;  %v1952_v44 = vld [vmem:[%s2806_s14 + $0x18] sm:$0xff]  }
 0x592   : > { %v1073_v46 = vpop.permute.xlu1 %1072 }
 0x593   : > { %v1078_v47 = vsel %vm855_vm3, %v1073_v46, 0 }
 0x594   : > { %1779 = vmatpush3.bf16.msra.mxu1 %v1078_v47 }
 0x595   : > { %1790 = vmatprep.subr.bf16.mxu1 %v2214_v8 }
 0x597   : > { %1781 = vmatmul.mubr.msk.bf16.vlgmr.msra.gmra.mrb[16].mxu1 %vm790_vm2, %v1071_v49 }
 0x598   : > { %1791 = vmatpush3.bf16.msra.mxu1 %v1188_v50  ;;  %1792 = vmatprep.mubr.msk.bf16.mxu1 %vm2215_vm1, %v2214_v8 }
 0x599   : > { %v1970_v51 = vpop.eup %1969  ;;  %1804 = vmatprep.subr.bf16.mxu1 %v2214_v8 }
 0x59a   : > { %v1180_v52 = vmul.f32 %v1970_v51, %v1962_v28 }
 0x59c   : > { %v1181_v53 = vpack.c.bf16 %v1180_v52, %v1180_v52 }
 0x59f   : > { %1793 = vmatmul.mubr.msk.bf16.vlgmr.msra.gmra.mrb[20].mxu1 %vm790_vm2, %v1181_v53 }
 0x5a0   : > { %1808 = vmatprep.mubr.msk.bf16.mxu1 %vm2215_vm1, %v2214_v8  ;;  %1805 = vmatpush3.bf16.msra.mxu1 %v1947_v30 }
 0x5a1   : > { %1806 = vmatprep.subr.bf16.mxu1 %v2214_v8 }
 0x63d   : > { %v893_v54 = vpop.f32.mrb[8].mxu1 }
 0x63e   : > { %v1758_v55 = vpop.f32.mrb[9].mxu1 }
 0x63f   : > { %v896_v56 = vpop.f32.mrb[10].mxu1 }
 0x640   : > { %v1759_v57 = vpop.f32.mrb[11].mxu1 }
 0x645   : > { %v1004_v58 = vpop.f32.mrb[12].mxu1 }
 0x646   : > { %1231 = vrot.lane.b32.xlu1 %v1004_v58, %s2223_s10  ;;  %v1770_v59 = vpop.f32.mrb[13].mxu1  ;;  %s1659_s10 = sshll.u32 %s2531_s8, 3 }
 0x647   : > { %v1007_v60 = vpop.f32.mrb[14].mxu1  ;;  %s618_s19 = scalar_lea.vmem [#allocation11], %s1659_s10  ;;  %s2226_s10 = smov [#allocation11]  }
 0x648   : > { %v1771_v61 = vpop.f32.mrb[15].mxu1  ;;  %s1513_s30 = sshll.u32 %s618_s19, 4  ;;  %s2704_s30 = int_to_ptr.vmem [resolvable:$true] %s1513_s30 }
 0x649   : > { %s2115_s18 = scalar_lea.vmem %s2704_s30, 128 }
 0x64a   : > { %p2116_p11 = scmp.ne.s32.totalorder %s2704_s30, %s2115_s18 }
 0x64c   : > { %p2117_p7 = pnand %p2116_p11, %p2812_p5 }
 0x64e   : > { %p2118_p10 = pneg %p2117_p7 }
 0x66a   : > { %v1114_v1 = vpop.f32.mrb[16].mxu1 }
 0x66b   : > { %1235 = vrot.lane.b32.xlu0 %v1114_v1, %s2224_s12  ;;  %v1782_v2 = vpop.f32.mrb[17].mxu1  ;;  %s2807_s12 = sld [smem:[#allocation20_spill]] }
 0x66c   : > { %v1117_v3 = vpop.f32.mrb[18].mxu1 }
 0x66d   : > { %v1783_v4 = vpop.f32.mrb[19].mxu1 }
 0x671   : > { %v1683_v38 = vld [vmem:[%s2807_s12] ss:$0 sm:$0xff]  ;;  %s2119_s12 = sshll.u32 %s2226_s10, 4  ;;  %s2120_s12 = int_to_ptr.vmem [resolvable:$false] %s2119_s12 }
 0x672   : > { %v1224_v5 = vpop.f32.mrb[20].mxu1  ;;  %p2122_p13 = scmp.lt.s32.totalorder %s2704_s30, %s2120_s12 }
 0x673   : > { %1239 = vrot.lane.b32.xlu1 %v1224_v5, %s2225_s7  ;;  %v1794_v6 = vpop.f32.mrb[21].mxu1  ;;  %s2121_s7 = scalar_lea.vmem %s2120_s12, 256 }
 0x674   : > { %v1227_v7 = vpop.f32.mrb[22].mxu1  ;;  %p2123_p2 = scmp.lt.s32.totalorder %s2121_s7, %s2115_s18 }
 0x675   : > { %v1795_v9 = vpop.f32.mrb[23].mxu1 }
 0x676   : > { %p2124_p8 = por %p2123_p2, %p2122_p13 }
 0x678   : > { %p2125_p9 = pnand %p2124_p8, %p2118_p10 }
 0x6b8   : > { %v1232_v10 = vpop.permute.xlu1 %1231 }
 0x6b9   : > { %v1242_v12 = vsel %vm790_vm2, %v893_v54, %v1232_v10 }
 0x6dd   : > { %v1236_v11 = vpop.permute.xlu0 %1235 }
 0x6de   : > { %v1244_v13 = vsel %vm1243_vm4, %v1242_v12, %v1236_v11 }
 0x6e5   : > { %v1240_v14 = vpop.permute.xlu1 %1239 }
 0x6e6   : > { %v1246_v15 = vsel %vm1245_vm5, %v1244_v13, %v1240_v14 }
 0x6e7   : > { %v1247_v16 = vpack.c.bf16 %v1246_v15, %v1246_v15 }
 0x6e9   : > { %1801 = vmatmul.mubr.msk.bf16.vlgmr.msra.gmra.mrb[16].mxu0 %vm625_vm0, %v1247_v16 }
 0x6ea   : > { %1820 = vmatprep.mubr.msk.bf16.mxu0 %vm2215_vm1, %v2214_v8  ;;  %1813 = vmatpush3.bf16.msra.mxu0 %v1949_v31 }
 0x6eb   : > { %1814 = vmatprep.subr.bf16.mxu0 %v2214_v8 }
 0x6ee   : > { %1815 = vmatpush3.bf16.msra.mxu0 %v1950_v32 }
 0x6ef   : > { %1816 = vmatprep.subr.bf16.mxu0 %v2214_v8 }
 0x6f2   : > { %1817 = vmatpush3.bf16.msra.mxu0 %v1951_v43 }
 0x6f3   : > { %1818 = vmatprep.subr.bf16.mxu0 %v2214_v8  ;;  %v1689_v8 = vld [vmem:[%s2810_s29] ss:$0 sm:$0xff] }
 0x6f6   : > { %1819 = vmatpush3.bf16.msra.mxu0 %v1952_v44 }
 0x7bc   : > { %v1308_v18 = vpop.f32.mrb[16].mxu0 }
 0x7bd   : > { %v1309_v19 = vadd.f32 %v1679_v17, %v1308_v18  ;;  %v1802_v20 = vpop.f32.mrb[17].mxu0 }
 0x7be   : > { %v1311_v21 = vpop.f32.mrb[18].mxu0 }
 0x7bf   : > { %v1314_v22 = vadd.f32 %v1309_v19, %v2554_v0  ;;  %v1803_v23 = vpop.f32.mrb[19].mxu0  ;;  %v1948_v0 = vld [vmem:[%s2805_s20 + $0x8] sm:$0xff]  }
 0x7c0   : > { %1807 = vmatpush3.bf16.msra.mxu1 %v1948_v0 }
 0x7c1   : > { %v1315_v24 = vsel %vm625_vm0, %v1314_v22, 0.0 }
 0x7c2   : > { %1316 = vadd.xlane.f32.xlu0 %v1315_v24 }
 0x84f   : > { %v1317_v25 = vpop.xlane.xlu0 %1316 }
 0x850   : > { %v1318_v26 = vmul.f32 0.03125, %v1317_v25 }
 0x852   : > { %v1319_v27 = vsub.f32 %v1314_v22, %v1318_v26 }
 0x854   : > { %v1320_v28 = vmul.f32 %v1319_v27, %v1319_v27 }
 0x856   : > { %v1321_v29 = vsel %vm625_vm0, %v1320_v28, 0.0 }
 0x857   : > { %1322 = vadd.xlane.f32.xlu1 %v1321_v29 }
 0x8e4   : > { %v1323_v34 = vpop.xlane.xlu1 %1322 }
 0x8e5   : > { %v1324_v35 = vmul.f32 0.03125, %v1323_v34 }
 0x8e7   : > { %v1325_v36 = vadd.f32 1e-05, %v1324_v35 }
 0x8e9   : > { %1971 = vrsqrt.f32 %v1325_v36 }
 0x8f3   : > { %v1972_v37 = vpop.eup %1971 }
 0x8f4   : > { %v1327_v39 = vmul.f32 %v1972_v37, %v1319_v27 }
 0x8f6   : > { %v1335_v41 = vmul.f32 %v1683_v38, %v1327_v39 }
 0x8f8   : > { %v1343_v33 = vadd.f32 %v1684_v40, %v1335_v41 }
 0x8fa   : > { %v1344_v42 = vpack.c.bf16 %v1343_v33, %v1343_v33 }
 0x8fc   : > { %1809 = vmatmul.mubr.msk.bf16.vlgmr.msra.gmra.mrb[24].mxu1 %vm625_vm0, %v1344_v42 }
 0x9cf   : > { %v1405_v46 = vpop.f32.mrb[24].mxu1 }
 0x9d0   : > { %v1406_v47 = vadd.f32 %v1685_v45, %v1405_v46  ;;  %v1810_v48 = vpop.f32.mrb[25].mxu1 }
 0x9d1   : > { %v1408_v49 = vpop.f32.mrb[26].mxu1 }
 0x9d2   : > { %v1411_v50 = vmax.f32 %v1406_v47, 0.0  ;;  %v1811_v51 = vpop.f32.mrb[27].mxu1 }
 0x9d4   : > { %v1412_v52 = vpack.c.bf16 %v1411_v50, %v1411_v50 }
 0x9d6   : > { %1821 = vmatmul.mubr.msk.bf16.vlgmr.msra.gmra.mrb[20].mxu0 %vm1452_vm6, %v1412_v52 }
 0xaa9   : > { %v1490_v53 = vpop.f32.mrb[20].mxu0 }
 0xaaa   : > { %v1491_v54 = vadd.f32 %v1689_v8, %v1490_v53  ;;  %v1822_v55 = vpop.f32.mrb[21].mxu0 }
 0xaab   : > { %v1493_v56 = vpop.f32.mrb[22].mxu0 }
 0xaac   : > { %v1496_v57 = vadd.f32 %v1491_v54, %v1314_v22  ;;  %v1823_v58 = vpop.f32.mrb[23].mxu0 }
 0xaae   : > { %1497 = vst.msk [vmem:[%s618_s19] sm:$0xff] %vm625_vm0, %v1496_v57 }
 0xaaf   : > { %2128 = shalt.err (!%p2125_p9)
}
 0xab0   : > { %s2129_s8 = scalar_lea.hbm %s2702_s27, 128  ;;  %s2133_s19 = scalar_lea.hbm %s2811_s17, 256 }
 0xab1   : > { %p2130_p4 = scmp.ne.s32.totalorder %s2702_s27, %s2129_s8  ;;  %p2134_p1 = scmp.lt.u32.totalorder %s2702_s27, %s2811_s17 }
 0xab2   : > { %p2135_p12 = scmp.lt.u32.totalorder %s2133_s19, %s2129_s8  ;;  %p2137_p11 = scmp.lt.u32.totalorder %s2129_s8, %s2702_s27 }
 0xab3   : > { %p2131_p6 = pnand %p2130_p4, %p2812_p5 }
 0xab4   : > { %p2136_p0 = por %p2135_p12, %p2134_p1 }
 0xab5   : > { %p2132_p3 = pneg %p2131_p6 }
 0xab6   : > { %p2138_p7 = por %p2137_p11, %p2136_p0 }
 0xab8   : > { %p2139_p10 = pnand %p2138_p7, %p2132_p3 }
 0xaba   : > { %2142 = shalt.err (!%p2139_p10)
}
 0xabb   : > { %1842 = dma.vmem_to_hbm [thread:$0]  (%p2812_p5), %s2704_s30, 128, %s2702_s27, %s1499_s24  }
 0xabc PF: > { %s1525_s18 = sand.u32 1, %s2185_s21   ;;  %p2813_p13 = scmp.ne.s32.totalorder %s2800_s0, 0 }
 0xabd   : > { %p2814_p2 = scmp.ge.s32.totalorder %s2205_s26, 2  ;;  %s1526_s10 = scalar_lea.sflag [#allocation4], %s1525_s18 }
 0xabf   : > { %p1862_p8 = pnand %p2814_p2, %p2813_p13 }
 0xac1   : > { %2180 = dma.done.wait (!%p1862_p8), %s1526_s10, 128  }
 0xac2   : > { %2182 = vsyncadd (!%p1862_p8), %s1526_s10, 4294967168  ;;  %s34_s26 = sadd.s32 1, %s2205_s26   ;;  %s2815_s21 = smov %s2189_s22 }
 0xac3   : > { %p31_p9 = scmp.ge.s32.totalorder %s34_s26, 4   ;;  %s2816_s22 = smov %s2193_s23 }
 0xac4   : > { %s2817_s23 = smov %s2481_s11  ;;  %s2818_s24 = smov %s2201_s25 }
 0xac5   : > { %s2819_s25 = smov %s2821_s5  ;;  %33 = sbr.rel (!%p31_p9) target bundleno = 20 (0x14), region = 148 }
 0xacc   :  { %1531 = vsyncpa [#allocation3], 1 }
 0xacd   :  { %1533 = vsyncpa [#allocation3 + $0x1], 1 }
 0xace   :  { %1534 = vsyncpa [#allocation6], 1 }
 0xacf   :  { %1535 = vsyncpa [#allocation9], 1 }
 0xad0   :  { %1536 = vsyncpa [#allocation4], 1 }
 0xad1   :  { %1538 = vsyncpa [#allocation4 + $0x1], 1 }

</bundles_post_ra>
